<compile_context>
chip_gen: v7x
topology: tpu7x:2x2x1
jax: 0.10.0
libtpu: 0.0.40
codegen_flags: <defaults>
</compile_context>

<pallas_src>
import functools

import numpy as np
import jax
import jax.numpy as jnp
from jax import lax
from jax.experimental import pallas as pl
from jax.experimental.pallas import tpu as pltpu


def _round_up(x, m):
    return (x + m - 1) // m * m


def _tap_offsets_and_masks(H, W):
    """For the 9 taps (sy, sx) of a 3x3 SAME conv: flat lane shift and 0/1 validity mask."""
    offsets, masks = [], []
    for sy in (-1, 0, 1):
        for sx in (-1, 0, 1):
            m = np.zeros((H, W), np.float32)
            y0, y1 = max(0, -sy), min(H, H - sy)
            x0, x1 = max(0, -sx), min(W, W - sx)
            m[y0:y1, x0:x1] = 1.0
            offsets.append(sy * W + sx)
            masks.append(m.reshape(H * W))
    return offsets, np.stack(masks, axis=0)          # list[9], (9, H*W)


def _decoder_kernel(x_ref, w1_ref, w2_ref, m_ref, out_ref, col1_ref, col2_ref,
                    *, H, W, B, Cinp, Cmidp, Cout, offsets):
    HW = H * W
    LW = B * HW
    K1_taps = 9 * Cinp
    K2_taps = 9 * Cmidp

    # Bias rides in the matmul: one constant-one col row (+ 7 zero rows so the write is a full
    # aligned 8-sublane tile).  Re-written every step (megacore-safe; see header comment).
    pad_blk = jnp.where(lax.broadcasted_iota(jnp.int32, (8, LW), 0) == 0,
                        jnp.float32(1.0), jnp.float32(0.0))
    col1_ref[K1_taps:K1_taps + 8, :] = pad_blk
    col2_ref[K2_taps:K2_taps + 8, :] = pad_blk

    # ---- im2col for conv1: per-image XLU lane rotation + validity mask ----
    # col[q] must hold x[(q + off) % HW]  ==  roll(x, shift=-off).
    for b in range(B):
        xb = x_ref[b]                                 # (Cinp, HW): stays resident in vregs
        lo = b * HW                                   # lane offset: multiple of 256 -> aligned
        for t, off in enumerate(offsets):
            if off == 0:                              # center tap: mask is all ones
                col1_ref[t * Cinp:(t + 1) * Cinp, lo:lo + HW] = xb
            else:
                col1_ref[t * Cinp:(t + 1) * Cinp, lo:lo + HW] = (
                    pltpu.roll(xb, shift=(-off) % HW, axis=1) * m_ref[t:t + 1, :HW])

    # ---- conv1 (BN + bias folded) + ReLU: one wide MXU matmul ----
    y1 = jnp.dot(w1_ref[...], col1_ref[...], preferred_element_type=jnp.float32)
    y1 = jnp.maximum(y1, 0.0)                         # (Cout, B*HW), lane-dense
    if Cmidp > Cout:                                  # sublane-pad so conv2 stores stay aligned
        y1 = jnp.concatenate(
            [y1, jnp.zeros((Cmidp - Cout, LW), jnp.float32)], axis=0)

    # ---- im2col for conv2: whole-slab rotation; the tiled masks also zero every lane that
    # wraps across an image boundary, so one roll covers all B images ----
    for t, off in enumerate(offsets):
        if off == 0:
            col2_ref[t * Cmidp:(t + 1) * Cmidp, :] = y1
        else:
            col2_ref[t * Cmidp:(t + 1) * Cmidp, :] = (
                pltpu.roll(y1, shift=(-off) % LW, axis=1) * m_ref[t:t + 1, :])

    # ---- conv2 (BN + bias folded) + ReLU ----
    y2 = jnp.dot(w2_ref[...], col2_ref[...], preferred_element_type=jnp.float32)
    y2 = jnp.maximum(y2, 0.0)                         # (Cout, B*HW)

    for b in range(B):                                # lane slices at multiples of HW: aligned
        out_ref[b] = y2[:, b * HW:(b + 1) * HW].astype(out_ref.dtype)


def _pick_images_per_step(N, max_b=8):
    """Largest divisor of N that is <= max_b while keeping >= 2 grid steps (v7x dual TC)."""
    best = 1
    for b in range(1, min(N, max_b) + 1):
        if N % b == 0 and (N // b >= 2 or N == 1):
            best = b
    return best


def decoder_forward(x_nchw, kernel_params, images_per_step=None):
    """kernel_params = (w1m, w2m) from fold_layer(); x_nchw: (N, Cin, H, W) f32."""
    w1m, w2m = kernel_params
    N, Cin, H, W = x_nchw.shape
    Cout = w1m.shape[0]
    HW = H * W
    Cinp = _round_up(Cin, 8)
    Cmidp = _round_up(Cout, 8)
    K1 = 9 * Cinp + 8                                 # 9 taps * padded-Cin + bias/pad rows
    K2 = 9 * Cmidp + 8
    assert w1m.shape == (Cout, K1) and w2m.shape == (Cout, K2)

    B = images_per_step if images_per_step is not None else _pick_images_per_step(N)
    assert N % B == 0
    G = N // B
    LW = B * HW

    offsets, masks_np = _tap_offsets_and_masks(H, W)
    masks = jnp.asarray(np.tile(masks_np, (1, B)))    # (9, B*HW), per-image mask tiled

    # Channel-pad the activations so per-tap col stores are full aligned sublane tiles.
    x_flat = x_nchw.reshape(N, Cin, HW)
    if Cinp > Cin:
        x_flat = jnp.pad(x_flat, ((0, 0), (0, Cinp - Cin), (0, 0)))

    kernel = functools.partial(_decoder_kernel, H=H, W=W, B=B, Cinp=Cinp, Cmidp=Cmidp,
                               Cout=Cout, offsets=offsets)

    out = pl.pallas_call(
        kernel,
        out_shape=jax.ShapeDtypeStruct((N, Cout, HW), jnp.float32),
        grid=(G,),
        in_specs=[
            pl.BlockSpec((B, Cinp, HW), lambda g: (g, 0, 0)),   # B images, channel-major flat
            pl.BlockSpec((Cout, K1), lambda g: (0, 0)),         # conv1 weights (BN+bias folded)
            pl.BlockSpec((Cout, K2), lambda g: (0, 0)),         # conv2 weights (BN+bias folded)
            pl.BlockSpec((9, LW), lambda g: (0, 0)),            # tap validity masks
        ],
        out_specs=pl.BlockSpec((B, Cout, HW), lambda g: (g, 0, 0)),
        scratch_shapes=[
            pltpu.VMEM((K1, LW), jnp.float32),                  # conv1 im2col (+ bias row)
            pltpu.VMEM((K2, LW), jnp.float32),                  # conv2 im2col (+ bias row)
        ],
        compiler_params=pltpu.CompilerParams(dimension_semantics=("parallel",)),
    )(x_flat, w1m, w2m, masks)

    return out.reshape(N, Cout, H, W)                 # already NCHW channel-major: no transpose


# ---------------- parameters (PyTorch-equivalent, eval-mode BN) ----------------

def make_raw_params(key, Cin, Cout):
    ks = jax.random.split(key, 12)

    def layer(kk, cin, cout):
        w = jax.random.normal(kk[0], (cout, cin, 3, 3), jnp.float32) * 0.2   # OIHW
        b = jax.random.normal(kk[1], (cout,), jnp.float32) * 0.1
        gamma = 1.0 + 0.1 * jax.random.normal(kk[2], (cout,), jnp.float32)
        beta = 0.1 * jax.random.normal(kk[3], (cout,), jnp.float32)
        mean = 0.1 * jax.random.normal(kk[4], (cout,), jnp.float32)
        var = jax.random.uniform(kk[5], (cout,), jnp.float32, minval=0.5, maxval=1.5)
        return (w, b, gamma, beta, mean, var)

    return layer(ks[:6], Cin, Cout), layer(ks[6:], Cout, Cout)


def fold_layer(layer, cin_pad, eps=1e-5):
    """Fold conv bias + eval-mode BN into a (Cout, 9*cin_pad + 8) weight matrix.

    Column layout matches the kernel's col buffer: column t*cin_pad + c holds tap t of
    (zero-padded) input channel c; column 9*cin_pad multiplies the constant-one bias row;
    the remaining 7 columns are zero padding.
    """
    w, b, gamma, beta, mean, var = layer
    cout, cin = w.shape[0], w.shape[1]
    scale = gamma / jnp.sqrt(var + eps)                               # (Cout,)
    wt = jnp.transpose(w, (0, 2, 3, 1)) * scale[:, None, None, None]  # (Cout, 3, 3, Cin)
    wt = jnp.pad(wt, ((0, 0), (0, 0), (0, 0), (0, cin_pad - cin)))    # align taps to 8 sublanes
    wmat = wt.reshape(cout, 9 * cin_pad)
    bias = beta + scale * (b - mean)                                  # (Cout,)
    bias_cols = jnp.zeros((cout, 8), jnp.float32).at[:, 0].set(bias)  # rides the ones-row
    return jnp.concatenate([wmat, bias_cols], axis=1)                 # (Cout, 9*cin_pad + 8)


def reference_forward(x_nchw, raw_params, eps=1e-5):
    def layer(x, p):
        w, b, gamma, beta, mean, var = p
        y = lax.conv_general_dilated(x, w, (1, 1), 'SAME',
                                     dimension_numbers=('NCHW', 'OIHW', 'NCHW'))
        y = y + b[None, :, None, None]
        y = (y - mean[None, :, None, None]) * (gamma / jnp.sqrt(var + eps))[None, :, None, None] \
            + beta[None, :, None, None]
        return jnp.maximum(y, 0.0)

    l1, l2 = raw_params
    return layer(layer(x_nchw, l1), l2)


if __name__ == "__main__":
    key = jax.random.PRNGKey(0)
    k_x, k_p = jax.random.split(key)

    # N=4 -> 2 grid steps ("parallel", feeds both v7x cores) x 2 images packed into lanes/step.
    N, Cin, Cout, H, W = 4, 4, 8, 16, 16
    x = jax.random.normal(k_x, (N, Cin, H, W), jnp.float32)

    raw = make_raw_params(k_p, Cin, Cout)
    Cinp, Cmidp = _round_up(Cin, 8), _round_up(Cout, 8)
    kparams = (fold_layer(raw[0], Cinp), fold_layer(raw[1], Cmidp))   # (w1m, w2m)

    out = decoder_forward(x, kparams)
    out = jax.block_until_ready(out)

    ref = reference_forward(x, raw)
    assert out.shape == (N, Cout, H, W)
    assert jnp.allclose(out, ref, rtol=1e-3, atol=1e-3), "mismatch vs JAX reference"

    print("KERNEL_OK")
</pallas_src>

<mosaic_0001>
module attributes {stable_mosaic.version = 11 : i64} {
  func.func @_decoder_kernel(%arg0: i32, %arg1: memref<2x8x256xf32, #tpu.memory_space<vmem>>, %arg2: memref<8x80xf32, #tpu.memory_space<vmem>>, %arg3: memref<8x80xf32, #tpu.memory_space<vmem>>, %arg4: memref<9x512xf32, #tpu.memory_space<vmem>>, %arg5: memref<2x8x256xf32, #tpu.memory_space<vmem>>, %arg6: memref<80x512xf32, #tpu.memory_space<vmem>>, %arg7: memref<80x512xf32, #tpu.memory_space<vmem>>) attributes {dimension_semantics = [#tpu.dimension_semantics<parallel>], iteration_bounds = array<i64: 2>, scalar_prefetch = 0 : i64, scratch_operands = 2 : i64, tpu.core_type = #tpu.core_type<tc>, window_params = [{transform_indices = @transform_0, window_bounds = array<i64: 2, 8, 256>}, {pipeline_mode = #tpu.pipeline_mode<synchronous>, transform_indices = @transform_1, window_bounds = array<i64: 8, 80>}, {pipeline_mode = #tpu.pipeline_mode<synchronous>, transform_indices = @transform_2, window_bounds = array<i64: 8, 80>}, {pipeline_mode = #tpu.pipeline_mode<synchronous>, transform_indices = @transform_3, window_bounds = array<i64: 9, 512>}, {transform_indices = @transform_4, window_bounds = array<i64: 2, 8, 256>}]} {
    %0 = tpu.iota {dimensions = array<i32: 0>} : vector<8x512xi32>
    %c0_i32 = arith.constant 0 : i32
    %1 = vector.broadcast %c0_i32 : i32 to vector<8x512xi32>
    %2 = arith.cmpi eq, %0, %1 : vector<8x512xi32>
    %cst = arith.constant 1.000000e+00 : f32
    %cst_0 = arith.constant 0.000000e+00 : f32
    %3 = vector.broadcast %cst : f32 to vector<8x512xf32>
    %4 = vector.broadcast %cst_0 : f32 to vector<8x512xf32>
    %5 = arith.select %2, %3, %4 : vector<8x512xi1>, vector<8x512xf32>
    %c72 = arith.constant 72 : index
    %c0 = arith.constant 0 : index
    %6 = vector.load %arg6[%c72, %c0] : memref<80x512xf32, #tpu.memory_space<vmem>>, vector<8x512xf32>
    tpu.vector_store %arg6[%c72, %c0], %5 {strides = array<i32>} : memref<80x512xf32, #tpu.memory_space<vmem>>, vector<8x512xf32>,
    %c72_1 = arith.constant 72 : index
    %c0_2 = arith.constant 0 : index
    %7 = vector.load %arg7[%c72_1, %c0_2] : memref<80x512xf32, #tpu.memory_space<vmem>>, vector<8x512xf32>
    tpu.vector_store %arg7[%c72_1, %c0_2], %5 {strides = array<i32>} : memref<80x512xf32, #tpu.memory_space<vmem>>, vector<8x512xf32>,
    %c0_3 = arith.constant 0 : index
    %c0_4 = arith.constant 0 : index
    %c0_5 = arith.constant 0 : index
    %8 = vector.load %arg1[%c0_3, %c0_4, %c0_5] : memref<2x8x256xf32, #tpu.memory_space<vmem>>, vector<1x8x256xf32>
    %9 = vector.shape_cast %8 : vector<1x8x256xf32> to vector<8x256xf32>
    %c17_i32 = arith.constant 17 : i32
    %10 = tpu.dynamic_rotate %9 by %c17_i32 dim 1 : vector<8x256xf32>, i32 -> vector<8x256xf32>
    %c0_6 = arith.constant 0 : index
    %c0_7 = arith.constant 0 : index
    %11 = vector.load %arg4[%c0_6, %c0_7] : memref<9x512xf32, #tpu.memory_space<vmem>>, vector<1x256xf32>
    %12 = vector.broadcast %11 : vector<1x256xf32> to vector<8x256xf32>
    %13 = arith.mulf %10, %12 : vector<8x256xf32>
    %c0_8 = arith.constant 0 : index
    %c0_9 = arith.constant 0 : index
    %14 = vector.load %arg6[%c0_8, %c0_9] : memref<80x512xf32, #tpu.memory_space<vmem>>, vector<8x256xf32>
    tpu.vector_store %arg6[%c0_8, %c0_9], %13 {strides = array<i32>} : memref<80x512xf32, #tpu.memory_space<vmem>>, vector<8x256xf32>,
    %c16_i32 = arith.constant 16 : i32
    %15 = tpu.dynamic_rotate %9 by %c16_i32 dim 1 : vector<8x256xf32>, i32 -> vector<8x256xf32>
    %c1 = arith.constant 1 : index
    %c0_10 = arith.constant 0 : index
    %16 = vector.load %arg4[%c1, %c0_10] : memref<9x512xf32, #tpu.memory_space<vmem>>, vector<1x256xf32>
    %17 = vector.broadcast %16 : vector<1x256xf32> to vector<8x256xf32>
    %18 = arith.mulf %15, %17 : vector<8x256xf32>
    %c8 = arith.constant 8 : index
    %c0_11 = arith.constant 0 : index
    %19 = vector.load %arg6[%c8, %c0_11] : memref<80x512xf32, #tpu.memory_space<vmem>>, vector<8x256xf32>
    tpu.vector_store %arg6[%c8, %c0_11], %18 {strides = array<i32>} : memref<80x512xf32, #tpu.memory_space<vmem>>, vector<8x256xf32>,
    %c15_i32 = arith.constant 15 : i32
    %20 = tpu.dynamic_rotate %9 by %c15_i32 dim 1 : vector<8x256xf32>, i32 -> vector<8x256xf32>
    %c2 = arith.constant 2 : index
    %c0_12 = arith.constant 0 : index
    %21 = vector.load %arg4[%c2, %c0_12] : memref<9x512xf32, #tpu.memory_space<vmem>>, vector<1x256xf32>
    %22 = vector.broadcast %21 : vector<1x256xf32> to vector<8x256xf32>
    %23 = arith.mulf %20, %22 : vector<8x256xf32>
    %c16 = arith.constant 16 : index
    %c0_13 = arith.constant 0 : index
    %24 = vector.load %arg6[%c16, %c0_13] : memref<80x512xf32, #tpu.memory_space<vmem>>, vector<8x256xf32>
    tpu.vector_store %arg6[%c16, %c0_13], %23 {strides = array<i32>} : memref<80x512xf32, #tpu.memory_space<vmem>>, vector<8x256xf32>,
    %c1_i32 = arith.constant 1 : i32
    %25 = tpu.dynamic_rotate %9 by %c1_i32 dim 1 : vector<8x256xf32>, i32 -> vector<8x256xf32>
    %c3 = arith.constant 3 : index
    %c0_14 = arith.constant 0 : index
    %26 = vector.load %arg4[%c3, %c0_14] : memref<9x512xf32, #tpu.memory_space<vmem>>, vector<1x256xf32>
    %27 = vector.broadcast %26 : vector<1x256xf32> to vector<8x256xf32>
    %28 = arith.mulf %25, %27 : vector<8x256xf32>
    %c24 = arith.constant 24 : index
    %c0_15 = arith.constant 0 : index
    %29 = vector.load %arg6[%c24, %c0_15] : memref<80x512xf32, #tpu.memory_space<vmem>>, vector<8x256xf32>
    tpu.vector_store %arg6[%c24, %c0_15], %28 {strides = array<i32>} : memref<80x512xf32, #tpu.memory_space<vmem>>, vector<8x256xf32>,
    %c32 = arith.constant 32 : index
    %c0_16 = arith.constant 0 : index
    %30 = vector.load %arg6[%c32, %c0_16] : memref<80x512xf32, #tpu.memory_space<vmem>>, vector<8x256xf32>
    tpu.vector_store %arg6[%c32, %c0_16], %9 {strides = array<i32>} : memref<80x512xf32, #tpu.memory_space<vmem>>, vector<8x256xf32>,
    %c255_i32 = arith.constant 255 : i32
    %31 = tpu.dynamic_rotate %9 by %c255_i32 dim 1 : vector<8x256xf32>, i32 -> vector<8x256xf32>
    %c5 = arith.constant 5 : index
    %c0_17 = arith.constant 0 : index
    %32 = vector.load %arg4[%c5, %c0_17] : memref<9x512xf32, #tpu.memory_space<vmem>>, vector<1x256xf32>
    %33 = vector.broadcast %32 : vector<1x256xf32> to vector<8x256xf32>
    %34 = arith.mulf %31, %33 : vector<8x256xf32>
    %c40 = arith.constant 40 : index
    %c0_18 = arith.constant 0 : index
    %35 = vector.load %arg6[%c40, %c0_18] : memref<80x512xf32, #tpu.memory_space<vmem>>, vector<8x256xf32>
    tpu.vector_store %arg6[%c40, %c0_18], %34 {strides = array<i32>} : memref<80x512xf32, #tpu.memory_space<vmem>>, vector<8x256xf32>,
    %c241_i32 = arith.constant 241 : i32
    %36 = tpu.dynamic_rotate %9 by %c241_i32 dim 1 : vector<8x256xf32>, i32 -> vector<8x256xf32>
    %c6 = arith.constant 6 : index
    %c0_19 = arith.constant 0 : index
    %37 = vector.load %arg4[%c6, %c0_19] : memref<9x512xf32, #tpu.memory_space<vmem>>, vector<1x256xf32>
    %38 = vector.broadcast %37 : vector<1x256xf32> to vector<8x256xf32>
    %39 = arith.mulf %36, %38 : vector<8x256xf32>
    %c48 = arith.constant 48 : index
    %c0_20 = arith.constant 0 : index
    %40 = vector.load %arg6[%c48, %c0_20] : memref<80x512xf32, #tpu.memory_space<vmem>>, vector<8x256xf32>
    tpu.vector_store %arg6[%c48, %c0_20], %39 {strides = array<i32>} : memref<80x512xf32, #tpu.memory_space<vmem>>, vector<8x256xf32>,
    %c240_i32 = arith.constant 240 : i32
    %41 = tpu.dynamic_rotate %9 by %c240_i32 dim 1 : vector<8x256xf32>, i32 -> vector<8x256xf32>
    %c7 = arith.constant 7 : index
    %c0_21 = arith.constant 0 : index
    %42 = vector.load %arg4[%c7, %c0_21] : memref<9x512xf32, #tpu.memory_space<vmem>>, vector<1x256xf32>
    %43 = vector.broadcast %42 : vector<1x256xf32> to vector<8x256xf32>
    %44 = arith.mulf %41, %43 : vector<8x256xf32>
    %c56 = arith.constant 56 : index
    %c0_22 = arith.constant 0 : index
    %45 = vector.load %arg6[%c56, %c0_22] : memref<80x512xf32, #tpu.memory_space<vmem>>, vector<8x256xf32>
    tpu.vector_store %arg6[%c56, %c0_22], %44 {strides = array<i32>} : memref<80x512xf32, #tpu.memory_space<vmem>>, vector<8x256xf32>,
    %c239_i32 = arith.constant 239 : i32
    %46 = tpu.dynamic_rotate %9 by %c239_i32 dim 1 : vector<8x256xf32>, i32 -> vector<8x256xf32>
    %c8_23 = arith.constant 8 : index
    %c0_24 = arith.constant 0 : index
    %47 = vector.load %arg4[%c8_23, %c0_24] : memref<9x512xf32, #tpu.memory_space<vmem>>, vector<1x256xf32>
    %48 = vector.broadcast %47 : vector<1x256xf32> to vector<8x256xf32>
    %49 = arith.mulf %46, %48 : vector<8x256xf32>
    %c64 = arith.constant 64 : index
    %c0_25 = arith.constant 0 : index
    %50 = vector.load %arg6[%c64, %c0_25] : memref<80x512xf32, #tpu.memory_space<vmem>>, vector<8x256xf32>
    tpu.vector_store %arg6[%c64, %c0_25], %49 {strides = array<i32>} : memref<80x512xf32, #tpu.memory_space<vmem>>, vector<8x256xf32>,
    %c1_26 = arith.constant 1 : index
    %c0_27 = arith.constant 0 : index
    %c0_28 = arith.constant 0 : index
    %51 = vector.load %arg1[%c1_26, %c0_27, %c0_28] : memref<2x8x256xf32, #tpu.memory_space<vmem>>, vector<1x8x256xf32>
    %52 = vector.shape_cast %51 : vector<1x8x256xf32> to vector<8x256xf32>
    %c17_i32_29 = arith.constant 17 : i32
    %53 = tpu.dynamic_rotate %52 by %c17_i32_29 dim 1 : vector<8x256xf32>, i32 -> vector<8x256xf32>
    %c0_30 = arith.constant 0 : index
    %c0_31 = arith.constant 0 : index
    %54 = vector.load %arg4[%c0_30, %c0_31] : memref<9x512xf32, #tpu.memory_space<vmem>>, vector<1x256xf32>
    %55 = vector.broadcast %54 : vector<1x256xf32> to vector<8x256xf32>
    %56 = arith.mulf %53, %55 : vector<8x256xf32>
    %c0_32 = arith.constant 0 : index
    %c256 = arith.constant 256 : index
    %57 = vector.load %arg6[%c0_32, %c256] : memref<80x512xf32, #tpu.memory_space<vmem>>, vector<8x256xf32>
    tpu.vector_store %arg6[%c0_32, %c256], %56 {strides = array<i32>} : memref<80x512xf32, #tpu.memory_space<vmem>>, vector<8x256xf32>,
    %c16_i32_33 = arith.constant 16 : i32
    %58 = tpu.dynamic_rotate %52 by %c16_i32_33 dim 1 : vector<8x256xf32>, i32 -> vector<8x256xf32>
    %c1_34 = arith.constant 1 : index
    %c0_35 = arith.constant 0 : index
    %59 = vector.load %arg4[%c1_34, %c0_35] : memref<9x512xf32, #tpu.memory_space<vmem>>, vector<1x256xf32>
    %60 = vector.broadcast %59 : vector<1x256xf32> to vector<8x256xf32>
    %61 = arith.mulf %58, %60 : vector<8x256xf32>
    %c8_36 = arith.constant 8 : index
    %c256_37 = arith.constant 256 : index
    %62 = vector.load %arg6[%c8_36, %c256_37] : memref<80x512xf32, #tpu.memory_space<vmem>>, vector<8x256xf32>
    tpu.vector_store %arg6[%c8_36, %c256_37], %61 {strides = array<i32>} : memref<80x512xf32, #tpu.memory_space<vmem>>, vector<8x256xf32>,
    %c15_i32_38 = arith.constant 15 : i32
    %63 = tpu.dynamic_rotate %52 by %c15_i32_38 dim 1 : vector<8x256xf32>, i32 -> vector<8x256xf32>
    %c2_39 = arith.constant 2 : index
    %c0_40 = arith.constant 0 : index
    %64 = vector.load %arg4[%c2_39, %c0_40] : memref<9x512xf32, #tpu.memory_space<vmem>>, vector<1x256xf32>
    %65 = vector.broadcast %64 : vector<1x256xf32> to vector<8x256xf32>
    %66 = arith.mulf %63, %65 : vector<8x256xf32>
    %c16_41 = arith.constant 16 : index
    %c256_42 = arith.constant 256 : index
    %67 = vector.load %arg6[%c16_41, %c256_42] : memref<80x512xf32, #tpu.memory_space<vmem>>, vector<8x256xf32>
    tpu.vector_store %arg6[%c16_41, %c256_42], %66 {strides = array<i32>} : memref<80x512xf32, #tpu.memory_space<vmem>>, vector<8x256xf32>,
    %c1_i32_43 = arith.constant 1 : i32
    %68 = tpu.dynamic_rotate %52 by %c1_i32_43 dim 1 : vector<8x256xf32>, i32 -> vector<8x256xf32>
    %c3_44 = arith.constant 3 : index
    %c0_45 = arith.constant 0 : index
    %69 = vector.load %arg4[%c3_44, %c0_45] : memref<9x512xf32, #tpu.memory_space<vmem>>, vector<1x256xf32>
    %70 = vector.broadcast %69 : vector<1x256xf32> to vector<8x256xf32>
    %71 = arith.mulf %68, %70 : vector<8x256xf32>
    %c24_46 = arith.constant 24 : index
    %c256_47 = arith.constant 256 : index
    %72 = vector.load %arg6[%c24_46, %c256_47] : memref<80x512xf32, #tpu.memory_space<vmem>>, vector<8x256xf32>
    tpu.vector_store %arg6[%c24_46, %c256_47], %71 {strides = array<i32>} : memref<80x512xf32, #tpu.memory_space<vmem>>, vector<8x256xf32>,
    %c32_48 = arith.constant 32 : index
    %c256_49 = arith.constant 256 : index
    %73 = vector.load %arg6[%c32_48, %c256_49] : memref<80x512xf32, #tpu.memory_space<vmem>>, vector<8x256xf32>
    tpu.vector_store %arg6[%c32_48, %c256_49], %52 {strides = array<i32>} : memref<80x512xf32, #tpu.memory_space<vmem>>, vector<8x256xf32>,
    %c255_i32_50 = arith.constant 255 : i32
    %74 = tpu.dynamic_rotate %52 by %c255_i32_50 dim 1 : vector<8x256xf32>, i32 -> vector<8x256xf32>
    %c5_51 = arith.constant 5 : index
    %c0_52 = arith.constant 0 : index
    %75 = vector.load %arg4[%c5_51, %c0_52] : memref<9x512xf32, #tpu.memory_space<vmem>>, vector<1x256xf32>
    %76 = vector.broadcast %75 : vector<1x256xf32> to vector<8x256xf32>
    %77 = arith.mulf %74, %76 : vector<8x256xf32>
    %c40_53 = arith.constant 40 : index
    %c256_54 = arith.constant 256 : index
    %78 = vector.load %arg6[%c40_53, %c256_54] : memref<80x512xf32, #tpu.memory_space<vmem>>, vector<8x256xf32>
    tpu.vector_store %arg6[%c40_53, %c256_54], %77 {strides = array<i32>} : memref<80x512xf32, #tpu.memory_space<vmem>>, vector<8x256xf32>,
    %c241_i32_55 = arith.constant 241 : i32
    %79 = tpu.dynamic_rotate %52 by %c241_i32_55 dim 1 : vector<8x256xf32>, i32 -> vector<8x256xf32>
    %c6_56 = arith.constant 6 : index
    %c0_57 = arith.constant 0 : index
    %80 = vector.load %arg4[%c6_56, %c0_57] : memref<9x512xf32, #tpu.memory_space<vmem>>, vector<1x256xf32>
    %81 = vector.broadcast %80 : vector<1x256xf32> to vector<8x256xf32>
    %82 = arith.mulf %79, %81 : vector<8x256xf32>
    %c48_58 = arith.constant 48 : index
    %c256_59 = arith.constant 256 : index
    %83 = vector.load %arg6[%c48_58, %c256_59] : memref<80x512xf32, #tpu.memory_space<vmem>>, vector<8x256xf32>
    tpu.vector_store %arg6[%c48_58, %c256_59], %82 {strides = array<i32>} : memref<80x512xf32, #tpu.memory_space<vmem>>, vector<8x256xf32>,
    %c240_i32_60 = arith.constant 240 : i32
    %84 = tpu.dynamic_rotate %52 by %c240_i32_60 dim 1 : vector<8x256xf32>, i32 -> vector<8x256xf32>
    %c7_61 = arith.constant 7 : index
    %c0_62 = arith.constant 0 : index
    %85 = vector.load %arg4[%c7_61, %c0_62] : memref<9x512xf32, #tpu.memory_space<vmem>>, vector<1x256xf32>
    %86 = vector.broadcast %85 : vector<1x256xf32> to vector<8x256xf32>
    %87 = arith.mulf %84, %86 : vector<8x256xf32>
    %c56_63 = arith.constant 56 : index
    %c256_64 = arith.constant 256 : index
    %88 = vector.load %arg6[%c56_63, %c256_64] : memref<80x512xf32, #tpu.memory_space<vmem>>, vector<8x256xf32>
    tpu.vector_store %arg6[%c56_63, %c256_64], %87 {strides = array<i32>} : memref<80x512xf32, #tpu.memory_space<vmem>>, vector<8x256xf32>,
    %c239_i32_65 = arith.constant 239 : i32
    %89 = tpu.dynamic_rotate %52 by %c239_i32_65 dim 1 : vector<8x256xf32>, i32 -> vector<8x256xf32>
    %c8_66 = arith.constant 8 : index
    %c0_67 = arith.constant 0 : index
    %90 = vector.load %arg4[%c8_66, %c0_67] : memref<9x512xf32, #tpu.memory_space<vmem>>, vector<1x256xf32>
    %91 = vector.broadcast %90 : vector<1x256xf32> to vector<8x256xf32>
    %92 = arith.mulf %89, %91 : vector<8x256xf32>
    %c64_68 = arith.constant 64 : index
    %c256_69 = arith.constant 256 : index
    %93 = vector.load %arg6[%c64_68, %c256_69] : memref<80x512xf32, #tpu.memory_space<vmem>>, vector<8x256xf32>
    tpu.vector_store %arg6[%c64_68, %c256_69], %92 {strides = array<i32>} : memref<80x512xf32, #tpu.memory_space<vmem>>, vector<8x256xf32>,
    %c0_70 = arith.constant 0 : index
    %c0_71 = arith.constant 0 : index
    %94 = vector.load %arg2[%c0_70, %c0_71] : memref<8x80xf32, #tpu.memory_space<vmem>>, vector<8x80xf32>
    %c0_72 = arith.constant 0 : index
    %c0_73 = arith.constant 0 : index
    %95 = vector.load %arg6[%c0_72, %c0_73] : memref<80x512xf32, #tpu.memory_space<vmem>>, vector<80x512xf32>
    %cst_74 = arith.constant dense<0.000000e+00> : vector<8x512xf32>
    %96 = tpu.matmul %94, %95, %cst_74 {dimension_numbers = #tpu.dot_dimension_numbers<[1], [0], [0], [1], [0, 0, 1, 1], [], []>} : vector<8x80xf32>, vector<80x512xf32>, vector<8x512xf32> -> vector<8x512xf32>
    %cst_75 = arith.constant 0.000000e+00 : f32
    %97 = vector.broadcast %cst_75 : f32 to vector<8x512xf32>
    %98 = arith.maximumf %96, %97 : vector<8x512xf32>
    %c17_i32_76 = arith.constant 17 : i32
    %99 = tpu.dynamic_rotate %98 by %c17_i32_76 dim 1 : vector<8x512xf32>, i32 -> vector<8x512xf32>
    %c0_77 = arith.constant 0 : index
    %c0_78 = arith.constant 0 : index
    %100 = vector.load %arg4[%c0_77, %c0_78] : memref<9x512xf32, #tpu.memory_space<vmem>>, vector<1x512xf32>
    %101 = vector.broadcast %100 : vector<1x512xf32> to vector<8x512xf32>
    %102 = arith.mulf %99, %101 : vector<8x512xf32>
    %c0_79 = arith.constant 0 : index
    %c0_80 = arith.constant 0 : index
    %103 = vector.load %arg7[%c0_79, %c0_80] : memref<80x512xf32, #tpu.memory_space<vmem>>, vector<8x512xf32>
    tpu.vector_store %arg7[%c0_79, %c0_80], %102 {strides = array<i32>} : memref<80x512xf32, #tpu.memory_space<vmem>>, vector<8x512xf32>,
    %c16_i32_81 = arith.constant 16 : i32
    %104 = tpu.dynamic_rotate %98 by %c16_i32_81 dim 1 : vector<8x512xf32>, i32 -> vector<8x512xf32>
    %c1_82 = arith.constant 1 : index
    %c0_83 = arith.constant 0 : index
    %105 = vector.load %arg4[%c1_82, %c0_83] : memref<9x512xf32, #tpu.memory_space<vmem>>, vector<1x512xf32>
    %106 = vector.broadcast %105 : vector<1x512xf32> to vector<8x512xf32>
    %107 = arith.mulf %104, %106 : vector<8x512xf32>
    %c8_84 = arith.constant 8 : index
    %c0_85 = arith.constant 0 : index
    %108 = vector.load %arg7[%c8_84, %c0_85] : memref<80x512xf32, #tpu.memory_space<vmem>>, vector<8x512xf32>
    tpu.vector_store %arg7[%c8_84, %c0_85], %107 {strides = array<i32>} : memref<80x512xf32, #tpu.memory_space<vmem>>, vector<8x512xf32>,
    %c15_i32_86 = arith.constant 15 : i32
    %109 = tpu.dynamic_rotate %98 by %c15_i32_86 dim 1 : vector<8x512xf32>, i32 -> vector<8x512xf32>
    %c2_87 = arith.constant 2 : index
    %c0_88 = arith.constant 0 : index
    %110 = vector.load %arg4[%c2_87, %c0_88] : memref<9x512xf32, #tpu.memory_space<vmem>>, vector<1x512xf32>
    %111 = vector.broadcast %110 : vector<1x512xf32> to vector<8x512xf32>
    %112 = arith.mulf %109, %111 : vector<8x512xf32>
    %c16_89 = arith.constant 16 : index
    %c0_90 = arith.constant 0 : index
    %113 = vector.load %arg7[%c16_89, %c0_90] : memref<80x512xf32, #tpu.memory_space<vmem>>, vector<8x512xf32>
    tpu.vector_store %arg7[%c16_89, %c0_90], %112 {strides = array<i32>} : memref<80x512xf32, #tpu.memory_space<vmem>>, vector<8x512xf32>,
    %c1_i32_91 = arith.constant 1 : i32
    %114 = tpu.dynamic_rotate %98 by %c1_i32_91 dim 1 : vector<8x512xf32>, i32 -> vector<8x512xf32>
    %c3_92 = arith.constant 3 : index
    %c0_93 = arith.constant 0 : index
    %115 = vector.load %arg4[%c3_92, %c0_93] : memref<9x512xf32, #tpu.memory_space<vmem>>, vector<1x512xf32>
    %116 = vector.broadcast %115 : vector<1x512xf32> to vector<8x512xf32>
    %117 = arith.mulf %114, %116 : vector<8x512xf32>
    %c24_94 = arith.constant 24 : index
    %c0_95 = arith.constant 0 : index
    %118 = vector.load %arg7[%c24_94, %c0_95] : memref<80x512xf32, #tpu.memory_space<vmem>>, vector<8x512xf32>
    tpu.vector_store %arg7[%c24_94, %c0_95], %117 {strides = array<i32>} : memref<80x512xf32, #tpu.memory_space<vmem>>, vector<8x512xf32>,
    %c32_96 = arith.constant 32 : index
    %c0_97 = arith.constant 0 : index
    %119 = vector.load %arg7[%c32_96, %c0_97] : memref<80x512xf32, #tpu.memory_space<vmem>>, vector<8x512xf32>
    tpu.vector_store %arg7[%c32_96, %c0_97], %98 {strides = array<i32>} : memref<80x512xf32, #tpu.memory_space<vmem>>, vector<8x512xf32>,
    %c511_i32 = arith.constant 511 : i32
    %120 = tpu.dynamic_rotate %98 by %c511_i32 dim 1 : vector<8x512xf32>, i32 -> vector<8x512xf32>
    %c5_98 = arith.constant 5 : index
    %c0_99 = arith.constant 0 : index
    %121 = vector.load %arg4[%c5_98, %c0_99] : memref<9x512xf32, #tpu.memory_space<vmem>>, vector<1x512xf32>
    %122 = vector.broadcast %121 : vector<1x512xf32> to vector<8x512xf32>
    %123 = arith.mulf %120, %122 : vector<8x512xf32>
    %c40_100 = arith.constant 40 : index
    %c0_101 = arith.constant 0 : index
    %124 = vector.load %arg7[%c40_100, %c0_101] : memref<80x512xf32, #tpu.memory_space<vmem>>, vector<8x512xf32>
    tpu.vector_store %arg7[%c40_100, %c0_101], %123 {strides = array<i32>} : memref<80x512xf32, #tpu.memory_space<vmem>>, vector<8x512xf32>,
    %c497_i32 = arith.constant 497 : i32
    %125 = tpu.dynamic_rotate %98 by %c497_i32 dim 1 : vector<8x512xf32>, i32 -> vector<8x512xf32>
    %c6_102 = arith.constant 6 : index
    %c0_103 = arith.constant 0 : index
    %126 = vector.load %arg4[%c6_102, %c0_103] : memref<9x512xf32, #tpu.memory_space<vmem>>, vector<1x512xf32>
    %127 = vector.broadcast %126 : vector<1x512xf32> to vector<8x512xf32>
    %128 = arith.mulf %125, %127 : vector<8x512xf32>
    %c48_104 = arith.constant 48 : index
    %c0_105 = arith.constant 0 : index
    %129 = vector.load %arg7[%c48_104, %c0_105] : memref<80x512xf32, #tpu.memory_space<vmem>>, vector<8x512xf32>
    tpu.vector_store %arg7[%c48_104, %c0_105], %128 {strides = array<i32>} : memref<80x512xf32, #tpu.memory_space<vmem>>, vector<8x512xf32>,
    %c496_i32 = arith.constant 496 : i32
    %130 = tpu.dynamic_rotate %98 by %c496_i32 dim 1 : vector<8x512xf32>, i32 -> vector<8x512xf32>
    %c7_106 = arith.constant 7 : index
    %c0_107 = arith.constant 0 : index
    %131 = vector.load %arg4[%c7_106, %c0_107] : memref<9x512xf32, #tpu.memory_space<vmem>>, vector<1x512xf32>
    %132 = vector.broadcast %131 : vector<1x512xf32> to vector<8x512xf32>
    %133 = arith.mulf %130, %132 : vector<8x512xf32>
    %c56_108 = arith.constant 56 : index
    %c0_109 = arith.constant 0 : index
    %134 = vector.load %arg7[%c56_108, %c0_109] : memref<80x512xf32, #tpu.memory_space<vmem>>, vector<8x512xf32>
    tpu.vector_store %arg7[%c56_108, %c0_109], %133 {strides = array<i32>} : memref<80x512xf32, #tpu.memory_space<vmem>>, vector<8x512xf32>,
    %c495_i32 = arith.constant 495 : i32
    %135 = tpu.dynamic_rotate %98 by %c495_i32 dim 1 : vector<8x512xf32>, i32 -> vector<8x512xf32>
    %c8_110 = arith.constant 8 : index
    %c0_111 = arith.constant 0 : index
    %136 = vector.load %arg4[%c8_110, %c0_111] : memref<9x512xf32, #tpu.memory_space<vmem>>, vector<1x512xf32>
    %137 = vector.broadcast %136 : vector<1x512xf32> to vector<8x512xf32>
    %138 = arith.mulf %135, %137 : vector<8x512xf32>
    %c64_112 = arith.constant 64 : index
    %c0_113 = arith.constant 0 : index
    %139 = vector.load %arg7[%c64_112, %c0_113] : memref<80x512xf32, #tpu.memory_space<vmem>>, vector<8x512xf32>
    tpu.vector_store %arg7[%c64_112, %c0_113], %138 {strides = array<i32>} : memref<80x512xf32, #tpu.memory_space<vmem>>, vector<8x512xf32>,
    %c0_114 = arith.constant 0 : index
    %c0_115 = arith.constant 0 : index
    %140 = vector.load %arg3[%c0_114, %c0_115] : memref<8x80xf32, #tpu.memory_space<vmem>>, vector<8x80xf32>
    %c0_116 = arith.constant 0 : index
    %c0_117 = arith.constant 0 : index
    %141 = vector.load %arg7[%c0_116, %c0_117] : memref<80x512xf32, #tpu.memory_space<vmem>>, vector<80x512xf32>
    %cst_118 = arith.constant dense<0.000000e+00> : vector<8x512xf32>
    %142 = tpu.matmul %140, %141, %cst_118 {dimension_numbers = #tpu.dot_dimension_numbers<[1], [0], [0], [1], [0, 0, 1, 1], [], []>} : vector<8x80xf32>, vector<80x512xf32>, vector<8x512xf32> -> vector<8x512xf32>
    %cst_119 = arith.constant 0.000000e+00 : f32
    %143 = vector.broadcast %cst_119 : f32 to vector<8x512xf32>
    %144 = arith.maximumf %142, %143 : vector<8x512xf32>
    %145 = vector.extract_strided_slice %144 {offsets = [0, 0], sizes = [8, 256], strides = [1, 1]} : vector<8x512xf32> to vector<8x256xf32>
    %c0_120 = arith.constant 0 : index
    %c0_121 = arith.constant 0 : index
    %c0_122 = arith.constant 0 : index
    %146 = vector.load %arg5[%c0_120, %c0_121, %c0_122] : memref<2x8x256xf32, #tpu.memory_space<vmem>>, vector<1x8x256xf32>
    %147 = vector.shape_cast %146 : vector<1x8x256xf32> to vector<8x256xf32>
    %148 = vector.shape_cast %145 : vector<8x256xf32> to vector<1x8x256xf32>
    tpu.vector_store %arg5[%c0_120, %c0_121, %c0_122], %148 {strides = array<i32>} : memref<2x8x256xf32, #tpu.memory_space<vmem>>, vector<1x8x256xf32>,
    %149 = vector.extract_strided_slice %144 {offsets = [0, 256], sizes = [8, 256], strides = [1, 1]} : vector<8x512xf32> to vector<8x256xf32>
    %c1_123 = arith.constant 1 : index
    %c0_124 = arith.constant 0 : index
    %c0_125 = arith.constant 0 : index
    %150 = vector.load %arg5[%c1_123, %c0_124, %c0_125] : memref<2x8x256xf32, #tpu.memory_space<vmem>>, vector<1x8x256xf32>
    %151 = vector.shape_cast %150 : vector<1x8x256xf32> to vector<8x256xf32>
    %152 = vector.shape_cast %149 : vector<8x256xf32> to vector<1x8x256xf32>
    tpu.vector_store %arg5[%c1_123, %c0_124, %c0_125], %152 {strides = array<i32>} : memref<2x8x256xf32, #tpu.memory_space<vmem>>, vector<1x8x256xf32>,
    return
  }
  func.func @transform_0(%arg0: i32) -> (i32, i32, i32) {
    %c0_i32 = arith.constant 0 : i32
    %c0_i32_0 = arith.constant 0 : i32
    %c0_i32_1 = arith.constant 0 : i32
    return %arg0, %c0_i32, %c0_i32_0 : i32, i32, i32
  }
  func.func @transform_1(%arg0: i32) -> (i32, i32) {
    %c0_i32 = arith.constant 0 : i32
    %c0_i32_0 = arith.constant 0 : i32
    %c0_i32_1 = arith.constant 0 : i32
    return %c0_i32, %c0_i32_0 : i32, i32
  }
  func.func @transform_2(%arg0: i32) -> (i32, i32) {
    %c0_i32 = arith.constant 0 : i32
    %c0_i32_0 = arith.constant 0 : i32
    %c0_i32_1 = arith.constant 0 : i32
    return %c0_i32, %c0_i32_0 : i32, i32
  }
  func.func @transform_3(%arg0: i32) -> (i32, i32) {
    %c0_i32 = arith.constant 0 : i32
    %c0_i32_0 = arith.constant 0 : i32
    %c0_i32_1 = arith.constant 0 : i32
    return %c0_i32, %c0_i32_0 : i32, i32
  }
  func.func @transform_4(%arg0: i32) -> (i32, i32, i32) {
    %c0_i32 = arith.constant 0 : i32
    %c0_i32_0 = arith.constant 0 : i32
    %c0_i32_1 = arith.constant 0 : i32
    return %arg0, %c0_i32, %c0_i32_0 : i32, i32, i32
  }
}

</mosaic_0001>

<bundles_post_ra>
// kernel: tpu_custom_call.1
= control target key start
LH: loop header
LB: loop body
LE: loop exit
PB: predicated region body
PF: predicated region fallthrough
CT: control target
= control target key end

     0   :  { %9 = vsyncpa [#allocation5], 0  ;;  %s2617_s0 = inlined_call_operand.hbm [shape: f32[4,8,256], index: 0, kind: input, shape index: {}]   ;;  %s2618_s1 = inlined_call_operand.hbm [shape: f32[8,80], index: 1, kind: input, shape index: {}]   ;;  %s2619_s2 = inlined_call_operand.hbm [shape: f32[8,80], index: 2, kind: input, shape index: {}]   ;;  %s2620_s3 = inlined_call_operand.hbm [shape: f32[9,512], index: 3, kind: input, shape index: {}]   ;;  %s2621_s4 = inlined_call_operand.hbm [shape: f32[4,8,256], index: 4, kind: output, shape index: {}]  }
   0x1   :  { %11 = vsyncpa [#allocation5 + $0x1], 0 }
   0x2   :  { %12 = vsyncpa [#allocation8], 0 }
   0x3   :  { %13 = vsyncpa [#allocation11], 0 }
   0x4   :  { %14 = vsyncpa [#allocation6], 0 }
   0x5   :  { %16 = vsyncpa [#allocation6 + $0x1], 0  ;;  %s1951_s15 = smov 0   ;;  %s1953_s16 = smov 0  }
   0x6   :  { %s1955_s17 = smov 0   ;;  %s1957_s18 = smov 0  }
   0x7 LB: > { %s1972_s19 = sadd.s32 4294967295, %s1903_s18   ;;  %s1492_s20 = sadd.s32 4294967294, %s1903_s18   ;;  %s1903_s18 = sphi %s1957_s18, %s2646_s18   ;;  %s1899_s17 = sphi %s1955_s17, %s2645_s17   ;;  %s1895_s16 = sphi %s1953_s16, %s2644_s16   ;;  %s1891_s15 = sphi %s1951_s15, %s2643_s15  }
   0x8   : > { %p42_p0 = scmp.ne.s32.totalorder %s1895_s16, %s1891_s15  ;;  %p2622_p1 = scmp.eq.s32.totalorder %s1972_s19, 0 }
   0x9   : > { %p135_p3 = scmp.eq.s32.totalorder %s1492_s20, 1  ;;  %p1493_p5 = scmp.ge.s32.totalorder %s1903_s18, 1 }
   0xa   : > { %p1981_p4 = por %p2622_p1, %p42_p0  ;;  %p142_p7 = scmp.lt.s32.totalorder %s1903_s18, 3 }
   0xb   : > { %p1986_p6 = por %p135_p3, %p42_p0  ;;  %s1905_s24 = smov [#allocation7]  }
   0xc   : > { %s2625_s21 = scalar_select %p1981_p4, 1, 0 }
   0xd   : > { %s2626_s22 = scalar_select %p1986_p6, 1, 0 }
   0xe   : > { %p1991_p8 = pnand %p1493_p5, %p142_p7  ;;  %s155_s25 = sshll.u32 %s1905_s24, 4  ;;  %s156_s25 = int_to_ptr.vmem [resolvable:$true] %s155_s25 }
   0xf   : > { %s1906_s26 = smov [#allocation9]   ;;  %s1907_s29 = smov [#allocation10]  }
  0x10   : > { %s2627_s23 = scalar_select %p1991_p8, 1, 0 }
  0x11   : > { %p1638_p10 = pneg %p1991_p8  ;;  %s166_s27 = sshll.u32 %s1906_s26, 4  ;;  %s2004_s27 = int_to_ptr.vmem [resolvable:$true] %s166_s27 }
  0x12   : > { %s176_s30 = sshll.u32 %s1907_s29, 4  ;;  %s1715_s7 = scalar_lea.hbm %s2618_s1, 128  ;;  %s2006_s30 = int_to_ptr.vmem [resolvable:$true] %s176_s30 }
  0x13   : > { %p2000_p11 = pnand %p1638_p10, %p2622_p1  ;;  %p1716_p12 = scmp.ne.s32.totalorder %s2618_s1, %s1715_s7 }
  0x14   : > { %p1722_p5 = scmp.lt.u32.totalorder %s1715_s7, %s2618_s1 }
  0x15   : > { %p2016_p13 = pneg %p2000_p11 }
  0x17   : > { %p1718_p0 = pnand %p2016_p13, %p1716_p12 }
  0x19   : > { %p1719_p3 = pneg %p1718_p0 }
  0x1b   : > { %p1724_p7 = pnand %p1722_p5, %p1719_p3 }
  0x1d   : > { %1727 = shalt.err (!%p1724_p7)
}
  0x1e   : > { %s1728_s13 = scalar_lea.vmem %s156_s25, 128  ;;  %p1736_p2 = scmp.lt.s32.totalorder %s156_s25, %s156_s25 }
  0x1f   : > { %p1729_p10 = scmp.ne.s32.totalorder %s156_s25, %s1728_s13  ;;  %p1737_p6 = scmp.lt.s32.totalorder %s1728_s13, %s1728_s13 }
  0x21   : > { %p1731_p9 = pnand %p1729_p10, %p2016_p13  ;;  %p1738_p4 = por %p1737_p6, %p1736_p2 }
  0x23   : > { %p1732_p1 = pneg %p1731_p9 }
  0x25   : > { %p1739_p8 = pnand %p1738_p4, %p1732_p1 }
  0x27   : > { %1742 = shalt.err (!%p1739_p8)
}
  0x28   : > { %1641 = dma.hbm_to_vmem [thread:$0]  (!%p2000_p11), %s2618_s1, 128, %s156_s25, [#allocation8]  }
  0x29   : > { %s1743_s29 = scalar_lea.hbm %s2619_s2, 128 }
  0x2a   : > { %p1744_p9 = scmp.ne.s32.totalorder %s2619_s2, %s1743_s29  ;;  %p1750_p1 = scmp.lt.u32.totalorder %s1743_s29, %s2619_s2 }
  0x2c   : > { %p1746_p12 = pnand %p1744_p9, %p2016_p13 }
  0x2e   : > { %p1747_p2 = pneg %p1746_p12 }
  0x30   : > { %p1752_p4 = pnand %p1750_p1, %p1747_p2 }
  0x32   : > { %1755 = shalt.err (!%p1752_p4)
}
  0x33   : > { %s1756_s25 = scalar_lea.vmem %s2004_s27, 128  ;;  %p1764_p3 = scmp.lt.s32.totalorder %s2004_s27, %s2004_s27 }
  0x34   : > { %p1757_p6 = scmp.ne.s32.totalorder %s2004_s27, %s1756_s25  ;;  %p1765_p5 = scmp.lt.s32.totalorder %s1756_s25, %s1756_s25 }
  0x36   : > { %p1759_p8 = pnand %p1757_p6, %p2016_p13  ;;  %p1766_p7 = por %p1765_p5, %p1764_p3 }
  0x38   : > { %p1760_p0 = pneg %p1759_p8 }
  0x3a   : > { %p1767_p10 = pnand %p1766_p7, %p1760_p0 }
  0x3c   : > { %1770 = shalt.err (!%p1767_p10)
}
  0x3d   : > { %1644 = dma.hbm_to_vmem [thread:$0]  (!%p2000_p11), %s2619_s2, 128, %s2004_s27, [#allocation8]  }
  0x3e   : > { %s1771_s14 = scalar_lea.hbm %s2620_s3, 1024 }
  0x3f   : > { %p1772_p9 = scmp.ne.s32.totalorder %s2620_s3, %s1771_s14  ;;  %p1778_p1 = scmp.lt.u32.totalorder %s1771_s14, %s2620_s3 }
  0x41   : > { %p1774_p12 = pnand %p1772_p9, %p2016_p13 }
  0x43   : > { %p1775_p2 = pneg %p1774_p12 }
  0x45   : > { %p1780_p4 = pnand %p1778_p1, %p1775_p2 }
  0x47   : > { %1783 = shalt.err (!%p1780_p4)
}
  0x48   : > { %s1784_s27 = scalar_lea.vmem %s2006_s30, 1024  ;;  %p1792_p3 = scmp.lt.s32.totalorder %s2006_s30, %s2006_s30 }
  0x49   : > { %p1785_p6 = scmp.ne.s32.totalorder %s2006_s30, %s1784_s27  ;;  %p1793_p5 = scmp.lt.s32.totalorder %s1784_s27, %s1784_s27 }
  0x4b   : > { %p1787_p8 = pnand %p1785_p6, %p2016_p13  ;;  %p1794_p7 = por %p1793_p5, %p1792_p3 }
  0x4d   : > { %p1788_p0 = pneg %p1787_p8 }
  0x4f   : > { %p1795_p10 = pnand %p1794_p7, %p1788_p0 }
  0x51   : > { %1798 = shalt.err (!%p1795_p10)
}
  0x52   : > { %s1908_s5 = smov 512   ;;  %s1909_s10 = smov 32  }
  0x53   : > { %1647 = dma.hbm_to_vmem [thread:$0]  (!%p2000_p11), %s2620_s3, 1024, %s2006_s30, [#allocation11], %s1908_s5, %s1908_s5, %s1909_s10  }
  0x54   : > { %s2079_s8 = sadd.s32 1, %s1903_s18   ;;  %s29_s9 = sadd.s32 1, %s1899_s17 }
  0x55   : > { %s26_s25 = ssub.s32 %s1903_s18, %s2079_s8  ;;  %p36_p9 = scmp.ne.s32.totalorder %s1899_s17, %s1895_s16 }
  0x56   : > { %p27_p13 = scmp.eq.s32.totalorder %s26_s25, 0  ;;  %p37_p12 = scmp.eq.s32.totalorder %s1903_s18, 0 }
  0x57   : > { %p1659_p2 = scmp.lt.s32.totalorder %s1903_s18, 2  ;;  %p2630_p4 = scmp.eq.s32.totalorder %s1972_s19, 1 }
  0x58   : > { %s2089_s11 = scalar_select %p27_p13, %s1899_s17, %s29_s9  }
  0x59   : > { %p38_p1 = por %p37_p12, %p36_p9  ;;  %p2093_p6 = por %p2630_p4, %p36_p9 }
  0x5a   : > { %s190_s28 = sand.u32 1, %s1899_s17   ;;  %s1523_s13 = sshll.u32 %s1903_s18, 9 }
  0x5b   : > { %s1498_s30 = sshll.u32 %s190_s28, 5  ;;  %s2102_s24 = scalar_lea.hbm %s2617_s0, %s1523_s13 }
  0x5c   : > { %s194_s26 = scalar_lea.vmem [#allocation4], %s1498_s30  ;;  %p2104_p11 = pnand %p1659_p2, %p38_p1 }
  0x5d   : > { %s202_s29 = sshll.u32 %s194_s26, 4  ;;  %s2110_s5 = scalar_lea.sflag [#allocation5], %s190_s28  ;;  %s2108_s29 = int_to_ptr.vmem [resolvable:$true] %s202_s29 }
  0x5e   : > { %s1799_s10 = scalar_lea.hbm %s2102_s24, 512  ;;  %p1801_p0 = pneg %p2104_p11 }
  0x5f   : > { %p1800_p8 = scmp.ne.s32.totalorder %s2102_s24, %s1799_s10  ;;  %s1804_s25 = scalar_lea.hbm %s2617_s0, 1024 }
  0x60   : > { %p1805_p7 = scmp.lt.u32.totalorder %s2102_s24, %s2617_s0  ;;  %p1806_p10 = scmp.lt.u32.totalorder %s1804_s25, %s1799_s10 }
  0x61   : > { %p1802_p3 = pnand %p1801_p0, %p1800_p8  ;;  %p1808_p9 = scmp.lt.u32.totalorder %s1799_s10, %s2102_s24 }
  0x62   : > { %p1807_p13 = por %p1806_p10, %p1805_p7 }
  0x63   : > { %p1803_p5 = pneg %p1802_p3 }
  0x64   : > { %p1809_p12 = por %p1808_p9, %p1807_p13 }
  0x66   : > { %p1810_p2 = pnand %p1809_p12, %p1803_p5 }
  0x68   : > { %1813 = shalt.err (!%p1810_p2)
}
  0x69   : > { %s1814_s28 = scalar_lea.vmem %s2108_s29, 512  ;;  %s1910_s30 = smov [#allocation4]  }
  0x6a   : > { %p1815_p1 = scmp.ne.s32.totalorder %s2108_s29, %s1814_s28  ;;  %s1819_s14 = sshll.u32 %s1910_s30, 4  ;;  %s1820_s14 = int_to_ptr.vmem [resolvable:$false] %s1819_s14 }
  0x6b   : > { %s1821_s20 = scalar_lea.vmem %s1820_s14, 1024  ;;  %p1822_p3 = scmp.lt.s32.totalorder %s2108_s29, %s1820_s14 }
  0x6c   : > { %p1817_p4 = pnand %p1815_p1, %p1801_p0  ;;  %p1823_p7 = scmp.lt.s32.totalorder %s1821_s20, %s1814_s28 }
  0x6e   : > { %p1818_p8 = pneg %p1817_p4  ;;  %p1824_p10 = por %p1823_p7, %p1822_p3 }
  0x70   : > { %p1825_p13 = pnand %p1824_p10, %p1818_p8 }
  0x72   : > { %1828 = shalt.err (!%p1825_p13)
}
  0x73   : > { %s1911_s26 = smov 256   ;;  %s1912_s10 = smov 16  }
  0x74   : > { %1651 = dma.hbm_to_vmem [thread:$0]  (!%p2104_p11), %s2102_s24, 512, %s2108_s29, %s2110_s5, %s1911_s26, %s1911_s26, %s1912_s10  }
  0x75   : > { %p2633_p0 = scmp.ne.s32.totalorder %s2627_s23, 0 }
  0x76   : > { %s2141_s6 = sand.u32 (!%p2633_p0), 1, %s1895_s16   ;;  %p2634_p5 = scmp.ne.s32.totalorder (!%p2633_p0), %s2625_s21, 0 }
  0x77   : > { %214 = sbr.rel (%p2633_p0) target bundleno = 944 (0x3b0), region = 36  ;;  %s1503_s7 = sshll.u32 (!%p2633_p0), %s2141_s6, 5 }
  0x78   : > { %s217_s25 = scalar_lea.sflag (!%p2633_p0), [#allocation5], %s2141_s6  ;;  %s220_s9 = scalar_lea.vmem (!%p2633_p0), [#allocation4], %s1503_s7 }
  0x7e   : > { %1874 = dma.done.wait (%p2634_p5), %s217_s25, 512  }
  0x7f   : > { %1876 = vsyncadd (%p2634_p5), %s217_s25, 4294966784  ;;  %p2635_p11 = scmp.eq.s32.totalorder %s1972_s19, 0 }
  0x81   : > { %1878 = dma.done.wait (%p2635_p11), [#allocation8], 256   ;;  %p2636_p9 = pmov %p2635_p11 }
  0x83   : > { %1880 = vsyncadd (%p2636_p9), [#allocation8], 4294967040  ;;  %p2637_p12 = pmov %p2636_p9 }
  0x84   : > { %p2638_p2 = pmov %p2636_p9 }
  0x85   : > { %1882 = dma.done.wait (%p2637_p12), [#allocation11], 1024  }
  0x86   : > { %1884 = vsyncadd (%p2638_p2), [#allocation11], 4294966272  ;;  %v2159_v0 = vld [vmem:[%s220_s9] sm:$0xff]  ;;  %s1913_s23 = smov 16   ;;  %s1914_s21 = smov 17   ;;  %v2165_v1 = vld [vmem:[%s220_s9 + $0x8] sm:$0xff]  ;;  %v259_v5 = vlaneseq }
  0x87   : > { %298 = vrot.lane.b32.xlu1 %v2159_v0, %s1913_s23  ;;  %273 = vrot.lane.b32.xlu0 %v2159_v0, %s1914_s21  ;;  %v2171_v2 = vld [vmem:[%s220_s9 + $0x18] sm:$0xff]  ;;  %v2173_v3 = vld [vmem:[%s220_s9 + $0x10] sm:$0xff]  ;;  %s1915_s24 = smov 15   ;;  %s1916_s29 = smov 1   ;;  %v1920_v4 = vmov 0.0   ;;  %vm1922_vm9 = vmmov 1  }
  0x88   : > { %s1917_s27 = smov 127   ;;  %s1918_s5 = smov 113   ;;  %758 = vmatprep.mubr.f32.mxu0 %v1920_v4  ;;  %829 = vmatprep.mubr.f32.mxu1 %v1920_v4  ;;  %v2233_v6 = vshrl.u32 %v259_v5, 7  ;;  %v2235_v7 = vand.u32 127, %v259_v5  ;;  %vm690_vm11 = vcmask 654336  }
  0x89   : > { %s1919_s13 = smov 112   ;;  %s1921_s28 = smov 111   ;;  %v306_v10 = vld [vmem:[#allocation10 + $0x1] ss:$8 sm:$0x3] }
  0x8a   : > { %v2238_v8 = vsub.s32 0, %v2233_v6  ;;  %v2241_v9 = vsub.s32 1, %v2233_v6  ;;  %v282_v11 = vld [vmem:[#allocation10] ss:$8 sm:$0x3]  ;;  %vm302_vm0 = vcmp.lt.s32.totalorder %v2235_v7, 16 }
  0x8b   : > { %300 = vrot.lane.b32.xlu1 %v2165_v1, %s1913_s23  ;;  %275 = vrot.lane.b32.xlu0 %v2165_v1, %s1914_s21  ;;  %vm279_vm1 = vcmp.lt.s32.totalorder %v2235_v7, 17  ;;  %v477_v28 = vld [vmem:[#allocation10] ss:$8 sm:$0x3]  ;;  %vm326_vm2 = vcmp.lt.s32.totalorder %v2235_v7, 15  ;;  %vm350_vm3 = vcmp.lt.s32.totalorder %v2235_v7, 1 }
  0x8c   : > { %v311_v14 = vrot.slane %v306_v10, %v2238_v8  ;;  %v287_v15 = vrot.slane %v282_v11, %v2238_v8  ;;  %v291_v16 = vrot.slane %v282_v11, %v2241_v9  ;;  %v315_v17 = vrot.slane %v306_v10, %v2241_v9  ;;  %v499_v29 = vld [vmem:[#allocation10 + $0x1] ss:$8 sm:$0x3]  ;;  %v330_v46 = vld [vmem:[#allocation10 + $0x2] ss:$8 sm:$0x3] }
  0x8d   : > { %v482_v34 = vrot.slane %v477_v28, %v2238_v8  ;;  %v504_v35 = vrot.slane %v499_v29, %v2238_v8  ;;  %v486_v36 = vrot.slane %v477_v28, %v2241_v9  ;;  %v508_v37 = vrot.slane %v499_v29, %v2241_v9  ;;  %v354_v49 = vld [vmem:[#allocation10 + $0x3] ss:$8 sm:$0x3]  ;;  %s256_s30 = scalar_lea.vmem [#allocation12], %s1503_s7  ;;  %s1525_s20 = sshll.u32 %s1972_s19, 9 }
  0x8e   : > { %v335_v54 = vrot.slane %v330_v46, %v2238_v8  ;;  %v339_v55 = vrot.slane %v330_v46, %v2241_v9  ;;  %v359_v56 = vrot.slane %v354_v49, %v2238_v8  ;;  %v363_v57 = vrot.slane %v354_v49, %v2241_v9  ;;  %s1390_s14 = sshll.u32 %s256_s30, 4  ;;  %s2572_s7 = scalar_lea.hbm %s2621_s4, %s1525_s20  ;;  %s2567_s14 = int_to_ptr.vmem [resolvable:$true] %s1390_s14 }
  0x8f   : > { %473 = vrot.lane.b32.xlu1 %v2171_v2, %s1914_s21  ;;  %471 = vrot.lane.b32.xlu0 %v2173_v3, %s1914_s21  ;;  %vm376_vm4 = vcmp.lt.s32.totalorder %v2235_v7, 127  ;;  %vm400_vm5 = vcmp.lt.s32.totalorder %v2235_v7, 113  ;;  %vm424_vm6 = vcmp.lt.s32.totalorder %v2235_v7, 112  ;;  %vm448_vm7 = vcmp.lt.s32.totalorder %v2235_v7, 111  ;;  %v1180_v7 = vld [vmem:[#allocation9] sm:$0xff]  ;;  %s1376_s19 = scalar_lea.sflag [#allocation6], %s2141_s6 }
  0x90   : > { %vm261_vm8 = vcmp.eq.s32.totalorder %v2233_v6, 0  ;;  %s1829_s25 = scalar_lea.vmem %s2567_s14, 512  ;;  %s1924_s9 = smov [#allocation12]  }
  0x91   : > { %vm2348_vm10 = vmpackc.low %vm261_vm8, %vm1922_vm9  ;;  %p1830_p1 = scmp.ne.s32.totalorder %s2567_s14, %s1829_s25 }
  0x93   : > { %495 = vrot.lane.b32.xlu1 %v2171_v2, %s1913_s23  ;;  %493 = vrot.lane.b32.xlu0 %v2173_v3, %s1913_s23  ;;  %p1831_p4 = pnand %p1830_p1, %p2093_p6 }
  0x95   : > { %p1832_p8 = pneg %p1831_p4 }
  0x97   : > { %324 = vrot.lane.b32.xlu1 %v2165_v1, %s1915_s24  ;;  %322 = vrot.lane.b32.xlu0 %v2159_v0, %s1915_s24 }
  0x9b   : > { %348 = vrot.lane.b32.xlu1 %v2165_v1, %s1916_s29  ;;  %346 = vrot.lane.b32.xlu0 %v2159_v0, %s1916_s29 }
  0x9f   : > { %517 = vrot.lane.b32.xlu1 %v2171_v2, %s1915_s24  ;;  %515 = vrot.lane.b32.xlu0 %v2173_v3, %s1915_s24 }
  0xa3   : > { %539 = vrot.lane.b32.xlu1 %v2171_v2, %s1916_s29  ;;  %537 = vrot.lane.b32.xlu0 %v2173_v3, %s1916_s29 }
  0xa7   : > { %374 = vrot.lane.b32.xlu1 %v2165_v1, %s1917_s27  ;;  %372 = vrot.lane.b32.xlu0 %v2159_v0, %s1917_s27 }
  0xab   : > { %563 = vrot.lane.b32.xlu1 %v2171_v2, %s1917_s27  ;;  %561 = vrot.lane.b32.xlu0 %v2173_v3, %s1917_s27 }
  0xaf   : > { %398 = vrot.lane.b32.xlu1 %v2165_v1, %s1918_s5  ;;  %396 = vrot.lane.b32.xlu0 %v2159_v0, %s1918_s5 }
  0xb3   : > { %422 = vrot.lane.b32.xlu1 %v2165_v1, %s1919_s13  ;;  %420 = vrot.lane.b32.xlu0 %v2159_v0, %s1919_s13 }
  0xb7   : > { %585 = vrot.lane.b32.xlu1 %v2171_v2, %s1918_s5  ;;  %583 = vrot.lane.b32.xlu0 %v2173_v3, %s1918_s5 }
  0xbb   : > { %607 = vrot.lane.b32.xlu1 %v2171_v2, %s1919_s13  ;;  %605 = vrot.lane.b32.xlu0 %v2173_v3, %s1919_s13 }
  0xbf   : > { %446 = vrot.lane.b32.xlu1 %v2165_v1, %s1921_s28  ;;  %444 = vrot.lane.b32.xlu0 %v2159_v0, %s1921_s28 }
  0xc3   : > { %629 = vrot.lane.b32.xlu1 %v2171_v2, %s1921_s28  ;;  %627 = vrot.lane.b32.xlu0 %v2173_v3, %s1921_s28 }
  0xf9   : > { %v299_v12 = vpop.permute.xlu1 %298  ;;  %v274_v13 = vpop.permute.xlu0 %273 }
  0xfd   : > { %v301_v18 = vpop.permute.xlu1 %300  ;;  %v276_v19 = vpop.permute.xlu0 %275 }
  0xfe   : > { %v303_v20 = vsel %vm302_vm0, %v299_v12, %v301_v18  ;;  %v304_v21 = vsel %vm302_vm0, %v301_v18, %v299_v12  ;;  %v280_v22 = vsel %vm279_vm1, %v274_v13, %v276_v19  ;;  %v281_v23 = vsel %vm279_vm1, %v276_v19, %v274_v13  ;;  %v521_v13 = vld [vmem:[#allocation10 + $0x2] ss:$8 sm:$0x3] }
  0xff   : > { %v318_v24 = vmul.f32 %v311_v14, %v304_v21  ;;  %v294_v25 = vmul.f32 %v287_v15, %v281_v23  ;;  %v295_v26 = vmul.f32 %v291_v16, %v280_v22  ;;  %v319_v27 = vmul.f32 %v315_v17, %v303_v20  ;;  %v543_v14 = vld [vmem:[#allocation10 + $0x3] ss:$8 sm:$0x3]  ;;  %v380_v23 = vld [vmem:[#allocation10 + $0x5] ss:$8 sm:$0x3] }
 0x100   : > { %v526_v19 = vrot.slane %v521_v13, %v2238_v8  ;;  %v530_v20 = vrot.slane %v521_v13, %v2241_v9  ;;  %v548_v21 = vrot.slane %v543_v14, %v2238_v8  ;;  %v552_v22 = vrot.slane %v543_v14, %v2241_v9 }
 0x101   : > { %v474_v30 = vpop.permute.xlu1 %473  ;;  %v472_v31 = vpop.permute.xlu0 %471  ;;  %v1534_v32 = vpack.c.bf16 %v319_v27, %v295_v26  ;;  %v1536_v33 = vpack.c.bf16 %v318_v24, %v294_v25 }
 0x102   : > { %v475_v38 = vsel %vm279_vm1, %v472_v31, %v474_v30  ;;  %v476_v39 = vsel %vm279_vm1, %v474_v30, %v472_v31  ;;  %v385_v30 = vrot.slane %v380_v23, %v2238_v8  ;;  %v389_v31 = vrot.slane %v380_v23, %v2241_v9 }
 0x103   : > { %1535 = vmatprep.subr.bf16.mxu0 %v1534_v32  ;;  %v489_v44 = vmul.f32 %v482_v34, %v476_v39  ;;  %v490_v47 = vmul.f32 %v486_v36, %v475_v38  ;;  %v567_v36 = vld [vmem:[#allocation10 + $0x5] ss:$8 sm:$0x3] }
 0x104   : > { %1537 = vmatpush1.bf16.msra.mxu0 %v1536_v33  ;;  %v576_v46 = vrot.slane %v567_v36, %v2241_v9 }
 0x105   : > { %v496_v40 = vpop.permute.xlu1 %495  ;;  %v494_v41 = vpop.permute.xlu0 %493 }
 0x106   : > { %v497_v42 = vsel %vm302_vm0, %v494_v41, %v496_v40  ;;  %v498_v43 = vsel %vm302_vm0, %v496_v40, %v494_v41 }
 0x107   : > { %v511_v45 = vmul.f32 %v504_v35, %v498_v43  ;;  %v512_v48 = vmul.f32 %v508_v37, %v497_v42 }
 0x109   : > { %v325_v50 = vpop.permute.xlu1 %324  ;;  %v323_v51 = vpop.permute.xlu0 %322  ;;  %v1556_v52 = vpack.c.bf16 %v512_v48, %v490_v47  ;;  %v1558_v53 = vpack.c.bf16 %v511_v45, %v489_v44  ;;  %v572_v45 = vrot.slane %v567_v36, %v2238_v8 }
 0x10a   : > { %v327_v58 = vsel %vm326_vm2, %v323_v51, %v325_v50  ;;  %v328_v59 = vsel %vm326_vm2, %v325_v50, %v323_v51 }
 0x10b   : > { %1557 = vmatprep.subr.bf16.mxu1 %v1556_v52  ;;  %v342_v5 = vmul.f32 %v335_v54, %v328_v59  ;;  %v343_v10 = vmul.f32 %v339_v55, %v327_v58  ;;  %v404_v55 = vld [vmem:[#allocation10 + $0x6] ss:$8 sm:$0x3] }
 0x10c   : > { %1559 = vmatpush1.bf16.msra.mxu1 %v1558_v53  ;;  %v409_v59 = vrot.slane %v404_v55, %v2238_v8 }
 0x10d   : > { %v349_v60 = vpop.permute.xlu1 %348  ;;  %v347_v61 = vpop.permute.xlu0 %346 }
 0x10e   : > { %v351_v62 = vsel %vm350_vm3, %v347_v61, %v349_v60  ;;  %v352_v63 = vsel %vm350_vm3, %v349_v60, %v347_v61  ;;  %v413_v60 = vrot.slane %v404_v55, %v2241_v9 }
 0x10f   : > { %v366_v11 = vmul.f32 %v359_v56, %v352_v63  ;;  %v367_v12 = vmul.f32 %v363_v57, %v351_v62  ;;  %v428_v56 = vld [vmem:[#allocation10 + $0x7] ss:$8 sm:$0x3] }
 0x110   : > { %v433_v61 = vrot.slane %v428_v56, %v2238_v8  ;;  %v437_v62 = vrot.slane %v428_v56, %v2241_v9 }
 0x111   : > { %v518_v15 = vpop.permute.xlu1 %517  ;;  %v516_v16 = vpop.permute.xlu0 %515  ;;  %v1538_v17 = vpack.c.bf16 %v367_v12, %v343_v10  ;;  %v1540_v18 = vpack.c.bf16 %v366_v11, %v342_v5 }
 0x112   : > { %v519_v24 = vsel %vm326_vm2, %v516_v16, %v518_v15  ;;  %v520_v25 = vsel %vm326_vm2, %v518_v15, %v516_v16  ;;  %v589_v16 = vld [vmem:[#allocation10 + $0x6] ss:$8 sm:$0x3] }
 0x113   : > { %1539 = vmatprep.subr.bf16.mxu0 %v1538_v17  ;;  %v533_v32 = vmul.f32 %v526_v19, %v520_v25  ;;  %v534_v33 = vmul.f32 %v530_v20, %v519_v24  ;;  %v611_v17 = vld [vmem:[#allocation10 + $0x7] ss:$8 sm:$0x3]  ;;  %v598_v23 = vrot.slane %v589_v16, %v2241_v9 }
 0x114   : > { %1541 = vmatpush1.bf16.msra.mxu0 %v1540_v18  ;;  %v616_v24 = vrot.slane %v611_v17, %v2238_v8  ;;  %v620_v25 = vrot.slane %v611_v17, %v2241_v9  ;;  %v2445_v17 = vsub.s32 3, %v2233_v6 }
 0x115   : > { %v540_v26 = vpop.permute.xlu1 %539  ;;  %v538_v27 = vpop.permute.xlu0 %537 }
 0x116   : > { %v541_v28 = vsel %vm350_vm3, %v538_v27, %v540_v26  ;;  %v542_v29 = vsel %vm350_vm3, %v540_v26, %v538_v27  ;;  %v452_v26 = vld [vmem:[#allocation10 + $0x20] ss:$8 sm:$0x3] }
 0x117   : > { %v555_v34 = vmul.f32 %v548_v21, %v542_v29  ;;  %v556_v35 = vmul.f32 %v552_v22, %v541_v28  ;;  %v594_v22 = vrot.slane %v589_v16, %v2238_v8 }
 0x119   : > { %v375_v37 = vpop.permute.xlu1 %374  ;;  %v373_v38 = vpop.permute.xlu0 %372  ;;  %v1560_v39 = vpack.c.bf16 %v556_v35, %v534_v33  ;;  %v1562_v40 = vpack.c.bf16 %v555_v34, %v533_v32  ;;  %v457_v33 = vrot.slane %v452_v26, %v2238_v8  ;;  %v461_v34 = vrot.slane %v452_v26, %v2241_v9 }
 0x11a   : > { %v377_v41 = vsel %vm376_vm4, %v373_v38, %v375_v37  ;;  %v378_v42 = vsel %vm376_vm4, %v375_v37, %v373_v38 }
 0x11b   : > { %v392_v43 = vmul.f32 %v385_v30, %v377_v41  ;;  %v393_v44 = vmul.f32 %v389_v31, %v378_v42  ;;  %1561 = vmatprep.subr.bf16.mxu1 %v1560_v39  ;;  %v633_v39 = vld [vmem:[#allocation10 + $0x20] ss:$8 sm:$0x3] }
 0x11c   : > { %1563 = vmatpush1.bf16.msra.mxu1 %v1562_v40 }
 0x11d   : > { %v564_v47 = vpop.permute.xlu1 %563  ;;  %v562_v48 = vpop.permute.xlu0 %561  ;;  %v1542_v49 = vpack.c.bf16 %v393_v44, %v2165_v1  ;;  %v1544_v50 = vpack.c.bf16 %v392_v43, %v2159_v0 }
 0x11e   : > { %v565_v51 = vsel %vm376_vm4, %v562_v48, %v564_v47  ;;  %v566_v52 = vsel %vm376_vm4, %v564_v47, %v562_v48  ;;  %v638_v48 = vrot.slane %v633_v39, %v2238_v8 }
 0x11f   : > { %v579_v53 = vmul.f32 %v572_v45, %v565_v51  ;;  %v580_v54 = vmul.f32 %v576_v46, %v566_v52  ;;  %1543 = vmatprep.subr.bf16.mxu0 %v1542_v49  ;;  %v642_v49 = vrot.slane %v633_v39, %v2241_v9  ;;  %v1923_v51 = vmov 1.0  }
 0x120   : > { %1545 = vmatpush1.bf16.msra.mxu0 %v1544_v50 }
 0x121   : > { %v399_v57 = vpop.permute.xlu1 %398  ;;  %v397_v58 = vpop.permute.xlu0 %396  ;;  %v1564_v1 = vpack.c.bf16 %v580_v54, %v2171_v2  ;;  %v1566_v0 = vpack.c.bf16 %v579_v53, %v2173_v3 }
 0x122   : > { %v401_v63 = vsel %vm400_vm5, %v397_v58, %v399_v57  ;;  %v402_v5 = vsel %vm400_vm5, %v399_v57, %v397_v58 }
 0x123   : > { %1565 = vmatprep.subr.bf16.mxu1 %v1564_v1  ;;  %v416_v12 = vmul.f32 %v409_v59, %v401_v63  ;;  %v417_v13 = vmul.f32 %v413_v60, %v402_v5 }
 0x124   : > { %1567 = vmatpush1.bf16.msra.mxu1 %v1566_v0  ;;  %v649_v0 = vld [vmem:[#allocation7] sm:$0xff] }
 0x125   : > { %v423_v2 = vpop.permute.xlu1 %422  ;;  %v421_v3 = vpop.permute.xlu0 %420 }
 0x126   : > { %v425_v10 = vsel %vm424_vm6, %v421_v3, %v423_v2  ;;  %v426_v11 = vsel %vm424_vm6, %v423_v2, %v421_v3 }
 0x127   : > { %v440_v14 = vmul.f32 %v433_v61, %v425_v10  ;;  %v441_v15 = vmul.f32 %v437_v62, %v426_v11 }
 0x129   : > { %v586_v18 = vpop.permute.xlu1 %585  ;;  %v584_v19 = vpop.permute.xlu0 %583  ;;  %v1546_v20 = vpack.c.bf16 %v441_v15, %v417_v13  ;;  %v1548_v21 = vpack.c.bf16 %v440_v14, %v416_v12  ;;  %v852_v13 = vld [vmem:[#allocation10] ss:$8 sm:$0xf]  ;;  %v894_v15 = vld [vmem:[#allocation10 + $0x1] ss:$8 sm:$0xf] }
 0x12a   : > { %v587_v27 = vsel %vm400_vm5, %v584_v19, %v586_v18  ;;  %v588_v28 = vsel %vm400_vm5, %v586_v18, %v584_v19  ;;  %v861_v18 = vrot.slane %v852_v13, %v2241_v9  ;;  %v903_v19 = vrot.slane %v894_v15, %v2241_v9 }
 0x12b   : > { %1547 = vmatprep.subr.bf16.mxu0 %v1546_v20  ;;  %v601_v35 = vmul.f32 %v594_v22, %v587_v27  ;;  %v602_v36 = vmul.f32 %v598_v23, %v588_v28 }
 0x12c   : > { %1549 = vmatpush1.bf16.msra.mxu0 %v1548_v21  ;;  %v2452_v21 = vsub.s32 2, %v2233_v6 }
 0x12d   : > { %v608_v29 = vpop.permute.xlu1 %607  ;;  %v606_v30 = vpop.permute.xlu0 %605 }
 0x12e   : > { %v609_v31 = vsel %vm424_vm6, %v606_v30, %v608_v29  ;;  %v610_v32 = vsel %vm424_vm6, %v608_v29, %v606_v30  ;;  %v907_v27 = vrot.slane %v894_v15, %v2452_v21  ;;  %v899_v30 = vrot.slane %v894_v15, %v2238_v8 }
 0x12f   : > { %v623_v37 = vmul.f32 %v616_v24, %v609_v31  ;;  %v624_v38 = vmul.f32 %v620_v25, %v610_v32  ;;  %v857_v24 = vrot.slane %v852_v13, %v2238_v8  ;;  %v869_v25 = vrot.slane %v852_v13, %v2445_v17 }
 0x130   : > { %v911_v31 = vrot.slane %v894_v15, %v2445_v17  ;;  %v865_v6 = vrot.slane %v852_v13, %v2452_v21 }
 0x131   : > { %v447_v40 = vpop.permute.xlu1 %446  ;;  %v445_v41 = vpop.permute.xlu0 %444  ;;  %v1568_v42 = vpack.c.bf16 %v624_v38, %v602_v36  ;;  %v1570_v43 = vpack.c.bf16 %v623_v37, %v601_v35 }
 0x132   : > { %v449_v44 = vsel %vm448_vm7, %v445_v41, %v447_v40  ;;  %v450_v45 = vsel %vm448_vm7, %v447_v40, %v445_v41 }
 0x133   : > { %v464_v46 = vmul.f32 %v457_v33, %v449_v44  ;;  %v465_v47 = vmul.f32 %v461_v34, %v450_v45  ;;  %1569 = vmatprep.subr.bf16.mxu1 %v1568_v42 }
 0x134   : > { %1571 = vmatpush1.bf16.msra.mxu1 %v1570_v43 }
 0x135   : > { %v1550_v52 = vpack.c.bf16 %v1923_v51, %v465_v47  ;;  %v1553_v53 = vpack.c.bf16 %v1923_v51, %v464_v46  ;;  %v630_v54 = vpop.permute.xlu1 %629  ;;  %v628_v55 = vpop.permute.xlu0 %627 }
 0x136   : > { %v631_v56 = vsel %vm448_vm7, %v628_v55, %v630_v54  ;;  %v632_v57 = vsel %vm448_vm7, %v630_v54, %v628_v55  ;;  %v936_v54 = vld [vmem:[#allocation10 + $0x2] ss:$8 sm:$0xf] }
 0x137   : > { %v645_v58 = vmul.f32 %v638_v48, %v631_v56  ;;  %v646_v1 = vmul.f32 %v642_v49, %v632_v57  ;;  %1552 = vmatprep.subr.msk.bf16.mxu0 %vm2348_vm10, %v1550_v52  ;;  %v978_v56 = vld [vmem:[#allocation10 + $0x3] ss:$8 sm:$0xf]  ;;  %v949_v15 = vrot.slane %v936_v54, %v2452_v21 }
 0x138   : > { %1555 = vmatpush1.bf16.msk.msra.mxu0 %vm2348_vm10, %v1553_v53  ;;  %v983_v13 = vrot.slane %v978_v56, %v2238_v8 }
 0x139   : > { %v1572_v59 = vpack.c.bf16 %v1923_v51, %v646_v1  ;;  %v1575_v60 = vpack.c.bf16 %v1923_v51, %v645_v58  ;;  %v945_v58 = vrot.slane %v936_v54, %v2241_v9  ;;  %v987_v1 = vrot.slane %v978_v56, %v2241_v9 }
 0x13b   : > { %1510 = vmatmul.mubr.msk.f32.vlgmr.msra.gmra.mrb[0].mxu0 %vm690_vm11, %v649_v0  ;;  %1574 = vmatprep.subr.msk.bf16.mxu1 %vm2348_vm10, %v1572_v59 }
 0x13c   : > { %1577 = vmatpush1.bf16.msk.msra.mxu1 %vm2348_vm10, %v1575_v60  ;;  %1288 = vmatprep.mubr.f32.mxu0 %v1920_v4 }
 0x13f   : > { %1511 = vmatmul.mubr.msk.f32.vlgmr.msra.gmra.mrb[0].mxu1 %vm690_vm11, %v649_v0 }
 0x140   : > { %1359 = vmatprep.mubr.f32.mxu1 %v1920_v4 }
 0x20e   : > { %v760_v61 = vpop.f32.mrb[0].mxu0 }
 0x20f   : > { %v2372_v62 = vmax.f32 %v760_v61, 0.0  ;;  %v762_v63 = vpop.f32.mrb[1].mxu0  ;;  %v941_v61 = vrot.slane %v936_v54, %v2238_v8 }
 0x210   : > { %v2374_v5 = vmax.f32 %v762_v63, 0.0  ;;  %v953_v63 = vrot.slane %v936_v54, %v2445_v17 }
 0x211   : > { %840 = vrot.lane.b32.xlu0 %v2372_v62, %s1914_s21 }
 0x212   : > { %842 = vrot.lane.b32.xlu1 %v2374_v5, %s1914_s21  ;;  %v831_v2 = vpop.f32.mrb[0].mxu1 }
 0x213   : > { %v2380_v3 = vmax.f32 %v831_v2, 0.0  ;;  %v833_v10 = vpop.f32.mrb[1].mxu1 }
 0x214   : > { %v2382_v11 = vmax.f32 %v833_v10, 0.0  ;;  %v991_v10 = vrot.slane %v978_v56, %v2452_v21 }
 0x215   : > { %844 = vrot.lane.b32.xlu0 %v2380_v3, %s1914_s21 }
 0x216   : > { %846 = vrot.lane.b32.xlu1 %v2382_v11, %s1914_s21  ;;  %s1833_s21 = sshll.u32 %s1924_s9, 4  ;;  %s1834_s21 = int_to_ptr.vmem [resolvable:$false] %s1833_s21 }
 0x217   : > { %p1836_p3 = scmp.lt.s32.totalorder %s2567_s14, %s1834_s21 }
 0x219   : > { %882 = vrot.lane.b32.xlu0 %v2372_v62, %s1913_s23 }
 0x21a   : > { %884 = vrot.lane.b32.xlu1 %v2374_v5, %s1913_s23 }
 0x21d   : > { %886 = vrot.lane.b32.xlu0 %v2380_v3, %s1913_s23 }
 0x21e   : > { %888 = vrot.lane.b32.xlu1 %v2382_v11, %s1913_s23 }
 0x221   : > { %924 = vrot.lane.b32.xlu0 %v2372_v62, %s1915_s24 }
 0x222   : > { %926 = vrot.lane.b32.xlu1 %v2374_v5, %s1915_s24 }
 0x225   : > { %928 = vrot.lane.b32.xlu0 %v2380_v3, %s1915_s24 }
 0x226   : > { %930 = vrot.lane.b32.xlu1 %v2382_v11, %s1915_s24  ;;  %s1835_s24 = scalar_lea.vmem %s1834_s21, 1024 }
 0x227   : > { %p1837_p7 = scmp.lt.s32.totalorder %s1835_s24, %s1829_s25 }
 0x229   : > { %966 = vrot.lane.b32.xlu0 %v2372_v62, %s1916_s29  ;;  %p1838_p10 = por %p1837_p7, %p1836_p3 }
 0x22a   : > { %968 = vrot.lane.b32.xlu1 %v2374_v5, %s1916_s29 }
 0x22b   : > { %p1839_p13 = pnand %p1838_p10, %p1832_p8 }
 0x22d   : > { %970 = vrot.lane.b32.xlu0 %v2380_v3, %s1916_s29 }
 0x22e   : > { %972 = vrot.lane.b32.xlu1 %v2382_v11, %s1916_s29 }
 0x231   : > { %1012 = vrot.lane.b32.xlu0 %v2372_v62, %s1917_s27 }
 0x232   : > { %1014 = vrot.lane.b32.xlu1 %v2374_v5, %s1917_s27 }
 0x235   : > { %1016 = vrot.lane.b32.xlu0 %v2380_v3, %s1917_s27 }
 0x236   : > { %1018 = vrot.lane.b32.xlu1 %v2382_v11, %s1917_s27 }
 0x239   : > { %1054 = vrot.lane.b32.xlu0 %v2372_v62, %s1918_s5 }
 0x23a   : > { %1056 = vrot.lane.b32.xlu1 %v2374_v5, %s1918_s5 }
 0x23d   : > { %1058 = vrot.lane.b32.xlu0 %v2380_v3, %s1918_s5 }
 0x23e   : > { %1060 = vrot.lane.b32.xlu1 %v2382_v11, %s1918_s5 }
 0x241   : > { %1096 = vrot.lane.b32.xlu0 %v2372_v62, %s1919_s13 }
 0x242   : > { %1098 = vrot.lane.b32.xlu1 %v2374_v5, %s1919_s13 }
 0x245   : > { %1100 = vrot.lane.b32.xlu0 %v2380_v3, %s1919_s13 }
 0x246   : > { %1102 = vrot.lane.b32.xlu1 %v2382_v11, %s1919_s13 }
 0x249   : > { %1138 = vrot.lane.b32.xlu0 %v2372_v62, %s1921_s28 }
 0x24a   : > { %1140 = vrot.lane.b32.xlu1 %v2374_v5, %s1921_s28 }
 0x24d   : > { %1142 = vrot.lane.b32.xlu0 %v2380_v3, %s1921_s28 }
 0x24e   : > { %1144 = vrot.lane.b32.xlu1 %v2382_v11, %s1921_s28 }
 0x283   : > { %v841_v4 = vpop.permute.xlu0 %840 }
 0x284   : > { %v843_v12 = vpop.permute.xlu1 %842 }
 0x285   : > { %v850_v20 = vsel %vm279_vm1, %v841_v4, %v843_v12 }
 0x286   : > { %v875_v28 = vmul.f32 %v861_v18, %v850_v20 }
 0x287   : > { %v845_v14 = vpop.permute.xlu0 %844 }
 0x288   : > { %v847_v16 = vpop.permute.xlu1 %846  ;;  %v849_v35 = vsel %vm279_vm1, %v843_v12, %v845_v14 }
 0x289   : > { %v848_v32 = vsel %vm279_vm1, %v845_v14, %v847_v16  ;;  %v851_v33 = vsel %vm279_vm1, %v847_v16, %v841_v4  ;;  %v876_v46 = vmul.f32 %v865_v6, %v849_v35  ;;  %v995_v14 = vrot.slane %v978_v56, %v2445_v17 }
 0x28a   : > { %v874_v42 = vmul.f32 %v857_v24, %v851_v33  ;;  %v877_v43 = vmul.f32 %v869_v25, %v848_v32 }
 0x28b   : > { %v883_v22 = vpop.permute.xlu0 %882 }
 0x28c   : > { %v885_v23 = vpop.permute.xlu1 %884 }
 0x28d   : > { %v892_v26 = vsel %vm302_vm0, %v883_v22, %v885_v23 }
 0x28e   : > { %v917_v29 = vmul.f32 %v903_v19, %v892_v26 }
 0x28f   : > { %v887_v34 = vpop.permute.xlu0 %886 }
 0x290   : > { %v891_v36 = vsel %vm302_vm0, %v885_v23, %v887_v34  ;;  %v889_v37 = vpop.permute.xlu1 %888  ;;  %v1578_v38 = vpack.c.bf16 %v917_v29, %v875_v28  ;;  %v1024_v28 = vld [vmem:[#allocation10 + $0x5] ss:$8 sm:$0xf] }
 0x291   : > { %v918_v39 = vmul.f32 %v907_v27, %v891_v36  ;;  %v890_v40 = vsel %vm302_vm0, %v887_v34, %v889_v37  ;;  %v893_v41 = vsel %vm302_vm0, %v889_v37, %v883_v22  ;;  %v1029_v35 = vrot.slane %v1024_v28, %v2238_v8 }
 0x292   : > { %v916_v44 = vmul.f32 %v899_v30, %v893_v41  ;;  %v919_v45 = vmul.f32 %v911_v31, %v890_v40  ;;  %1579 = vmatprep.subr.bf16.mxu0 %v1578_v38  ;;  %v1033_v40 = vrot.slane %v1024_v28, %v2241_v9  ;;  %v1037_v41 = vrot.slane %v1024_v28, %v2452_v21 }
 0x293   : > { %v925_v47 = vpop.permute.xlu0 %924  ;;  %v1602_v53 = vpack.c.bf16 %v918_v39, %v876_v46 }
 0x294   : > { %v1580_v48 = vpack.c.bf16 %v916_v44, %v874_v42  ;;  %v927_v49 = vpop.permute.xlu1 %926  ;;  %v1600_v52 = vpack.c.bf16 %v919_v45, %v877_v43  ;;  %v1041_v42 = vrot.slane %v1024_v28, %v2445_v17 }
 0x295   : > { %v934_v0 = vsel %vm326_vm2, %v925_v47, %v927_v49 }
 0x296   : > { %1581 = vmatpush1.bf16.msra.mxu0 %v1580_v48  ;;  %1601 = vmatprep.subr.bf16.mxu1 %v1600_v52  ;;  %v959_v4 = vmul.f32 %v945_v58, %v934_v0 }
 0x297   : > { %1603 = vmatpush1.bf16.msra.mxu1 %v1602_v53  ;;  %v929_v55 = vpop.permute.xlu0 %928 }
 0x298   : > { %v931_v57 = vpop.permute.xlu1 %930  ;;  %v933_v20 = vsel %vm326_vm2, %v927_v49, %v929_v55 }
 0x299   : > { %v932_v16 = vsel %vm326_vm2, %v929_v55, %v931_v57  ;;  %v935_v18 = vsel %vm326_vm2, %v931_v57, %v925_v47  ;;  %v960_v32 = vmul.f32 %v949_v15, %v933_v20 }
 0x29a   : > { %v958_v29 = vmul.f32 %v941_v61, %v935_v18  ;;  %v961_v30 = vmul.f32 %v953_v63, %v932_v16  ;;  %v1108_v61 = vld [vmem:[#allocation10 + $0x7] ss:$8 sm:$0xf] }
 0x29b   : > { %v967_v59 = vpop.permute.xlu0 %966  ;;  %v1121_v15 = vrot.slane %v1108_v61, %v2452_v21  ;;  %v1125_v16 = vrot.slane %v1108_v61, %v2445_v17 }
 0x29c   : > { %v969_v60 = vpop.permute.xlu1 %968 }
 0x29d   : > { %v976_v2 = vsel %vm350_vm3, %v967_v59, %v969_v60 }
 0x29e   : > { %v1001_v12 = vmul.f32 %v987_v1, %v976_v2 }
 0x29f   : > { %v971_v19 = vpop.permute.xlu0 %970 }
 0x2a0   : > { %v975_v22 = vsel %vm350_vm3, %v969_v60, %v971_v19  ;;  %v973_v23 = vpop.permute.xlu1 %972  ;;  %v1582_v24 = vpack.c.bf16 %v1001_v12, %v959_v4  ;;  %v1066_v60 = vld [vmem:[#allocation10 + $0x6] ss:$8 sm:$0xf]  ;;  %v1117_v12 = vrot.slane %v1108_v61, %v2241_v9 }
 0x2a1   : > { %v1002_v25 = vmul.f32 %v991_v10, %v975_v22  ;;  %v974_v26 = vsel %vm350_vm3, %v971_v19, %v973_v23  ;;  %v977_v27 = vsel %vm350_vm3, %v973_v23, %v967_v59  ;;  %v1071_v2 = vrot.slane %v1066_v60, %v2238_v8 }
 0x2a2   : > { %v1000_v31 = vmul.f32 %v983_v13, %v977_v27  ;;  %v1003_v6 = vmul.f32 %v995_v14, %v974_v26  ;;  %1583 = vmatprep.subr.bf16.mxu0 %v1582_v24  ;;  %v1083_v14 = vrot.slane %v1066_v60, %v2445_v17 }
 0x2a3   : > { %v1013_v33 = vpop.permute.xlu0 %1012  ;;  %v1606_v38 = vpack.c.bf16 %v1002_v25, %v960_v32 }
 0x2a4   : > { %v1584_v34 = vpack.c.bf16 %v1000_v31, %v958_v29  ;;  %v1015_v36 = vpop.permute.xlu1 %1014  ;;  %v1604_v37 = vpack.c.bf16 %v1003_v6, %v961_v30  ;;  %v1150_v30 = vld [vmem:[#allocation10 + $0x20] ss:$8 sm:$0xf] }
 0x2a5   : > { %v1022_v39 = vsel %vm376_vm4, %v1013_v33, %v1015_v36 }
 0x2a6   : > { %1585 = vmatpush1.bf16.msra.mxu0 %v1584_v34  ;;  %1605 = vmatprep.subr.bf16.mxu1 %v1604_v37  ;;  %v1046_v44 = vmul.f32 %v1029_v35, %v1022_v39 }
 0x2a7   : > { %1607 = vmatpush1.bf16.msra.mxu1 %v1606_v38  ;;  %v1017_v43 = vpop.permute.xlu0 %1016  ;;  %v1155_v38 = vrot.slane %v1150_v30, %v2238_v8 }
 0x2a8   : > { %v1021_v45 = vsel %vm376_vm4, %v1015_v36, %v1017_v43  ;;  %v1019_v46 = vpop.permute.xlu1 %1018  ;;  %v1588_v56 = vpack.c.bf16 %v1046_v44, %v2372_v62  ;;  %v1113_v62 = vrot.slane %v1108_v61, %v2238_v8  ;;  %v1167_v44 = vrot.slane %v1150_v30, %v2445_v17 }
 0x2a9   : > { %v1047_v47 = vmul.f32 %v1033_v40, %v1021_v45  ;;  %v1020_v48 = vsel %vm376_vm4, %v1017_v43, %v1019_v46  ;;  %v1023_v49 = vsel %vm376_vm4, %v1019_v46, %v1013_v33  ;;  %v1163_v43 = vrot.slane %v1150_v30, %v2452_v21 }
 0x2aa   : > { %v1048_v52 = vmul.f32 %v1037_v41, %v1020_v48  ;;  %v1049_v53 = vmul.f32 %v1041_v42, %v1023_v49  ;;  %v1159_v42 = vrot.slane %v1150_v30, %v2241_v9 }
 0x2ab   : > { %v1055_v54 = vpop.permute.xlu0 %1054  ;;  %v1586_v55 = vpack.c.bf16 %v1047_v47, %v2374_v5  ;;  %v1075_v5 = vrot.slane %v1066_v60, %v2241_v9 }
 0x2ac   : > { %v1610_v57 = vpack.c.bf16 %v1048_v52, %v2380_v3  ;;  %v1057_v58 = vpop.permute.xlu1 %1056  ;;  %v1608_v1 = vpack.c.bf16 %v1049_v53, %v2382_v11  ;;  %v1079_v11 = vrot.slane %v1066_v60, %v2452_v21 }
 0x2ad   : > { %1587 = vmatprep.subr.bf16.mxu0 %v1586_v55  ;;  %v1064_v3 = vsel %vm400_vm5, %v1055_v54, %v1057_v58 }
 0x2ae   : > { %1589 = vmatpush1.bf16.msra.mxu0 %v1588_v56  ;;  %1609 = vmatprep.subr.bf16.mxu1 %v1608_v1  ;;  %v1088_v22 = vmul.f32 %v1071_v2, %v1064_v3 }
 0x2af   : > { %1611 = vmatpush1.bf16.msra.mxu1 %v1610_v57  ;;  %v1059_v0 = vpop.permute.xlu0 %1058 }
 0x2b0   : > { %v1061_v59 = vpop.permute.xlu1 %1060  ;;  %v1063_v13 = vsel %vm400_vm5, %v1057_v58, %v1059_v0 }
 0x2b1   : > { %v1062_v18 = vsel %vm400_vm5, %v1059_v0, %v1061_v59  ;;  %v1065_v19 = vsel %vm400_vm5, %v1061_v59, %v1055_v54  ;;  %v1089_v26 = vmul.f32 %v1075_v5, %v1063_v13 }
 0x2b2   : > { %v1090_v31 = vmul.f32 %v1079_v11, %v1062_v18  ;;  %v1091_v6 = vmul.f32 %v1083_v14, %v1065_v19 }
 0x2b3   : > { %v1097_v63 = vpop.permute.xlu0 %1096 }
 0x2b4   : > { %v1099_v10 = vpop.permute.xlu1 %1098 }
 0x2b5   : > { %v1106_v4 = vsel %vm424_vm6, %v1097_v63, %v1099_v10 }
 0x2b6   : > { %v1130_v23 = vmul.f32 %v1113_v62, %v1106_v4 }
 0x2b7   : > { %v1101_v20 = vpop.permute.xlu0 %1100 }
 0x2b8   : > { %v1105_v24 = vsel %vm424_vm6, %v1099_v10, %v1101_v20  ;;  %v1103_v25 = vpop.permute.xlu1 %1102  ;;  %v1592_v36 = vpack.c.bf16 %v1130_v23, %v1088_v22 }
 0x2b9   : > { %v1131_v27 = vmul.f32 %v1117_v12, %v1105_v24  ;;  %v1104_v28 = vsel %vm424_vm6, %v1101_v20, %v1103_v25  ;;  %v1107_v29 = vsel %vm424_vm6, %v1103_v25, %v1097_v63 }
 0x2ba   : > { %v1132_v32 = vmul.f32 %v1121_v15, %v1104_v28  ;;  %v1133_v33 = vmul.f32 %v1125_v16, %v1107_v29 }
 0x2bb   : > { %v1139_v34 = vpop.permute.xlu0 %1138  ;;  %v1590_v35 = vpack.c.bf16 %v1131_v27, %v1089_v26 }
 0x2bc   : > { %v1614_v37 = vpack.c.bf16 %v1132_v32, %v1090_v31  ;;  %v1141_v39 = vpop.permute.xlu1 %1140  ;;  %v1612_v40 = vpack.c.bf16 %v1133_v33, %v1091_v6 }
 0x2bd   : > { %v1148_v41 = vsel %vm448_vm7, %v1139_v34, %v1141_v39  ;;  %1591 = vmatprep.subr.bf16.mxu0 %v1590_v35 }
 0x2be   : > { %1593 = vmatpush1.bf16.msra.mxu0 %v1592_v36  ;;  %1613 = vmatprep.subr.bf16.mxu1 %v1612_v40  ;;  %v1172_v46 = vmul.f32 %v1155_v38, %v1148_v41 }
 0x2bf   : > { %1615 = vmatpush1.bf16.msra.mxu1 %v1614_v37  ;;  %v1143_v45 = vpop.permute.xlu0 %1142 }
 0x2c0   : > { %v1147_v8 = vsel %vm448_vm7, %v1141_v39, %v1143_v45  ;;  %v1145_v47 = vpop.permute.xlu1 %1144  ;;  %v1597_v53 = vpack.c.bf16 %v1923_v51, %v1172_v46 }
 0x2c1   : > { %v1173_v48 = vmul.f32 %v1159_v42, %v1147_v8  ;;  %v1146_v49 = vsel %vm448_vm7, %v1143_v45, %v1145_v47  ;;  %v1149_v9 = vsel %vm448_vm7, %v1145_v47, %v1139_v34 }
 0x2c2   : > { %v1174_v52 = vmul.f32 %v1163_v43, %v1146_v49  ;;  %v1175_v21 = vmul.f32 %v1167_v44, %v1149_v9 }
 0x2c3   : > { %v1594_v17 = vpack.c.bf16 %v1923_v51, %v1173_v48 }
 0x2c4   : > { %v1616_v54 = vpack.c.bf16 %v1923_v51, %v1175_v21  ;;  %v1619_v55 = vpack.c.bf16 %v1923_v51, %v1174_v52 }
 0x2c5   : > { %1596 = vmatprep.subr.msk.bf16.mxu0 %vm2348_vm10, %v1594_v17 }
 0x2c6   : > { %1599 = vmatpush1.bf16.msk.msra.mxu0 %vm2348_vm10, %v1597_v53  ;;  %1618 = vmatprep.subr.msk.bf16.mxu1 %vm2348_vm10, %v1616_v54 }
 0x2c7   : > { %1621 = vmatpush1.bf16.msk.msra.mxu1 %vm2348_vm10, %v1619_v55 }
 0x2c9   : > { %1512 = vmatmul.mubr.msk.f32.vlgmr.msra.gmra.mrb[2].mxu0 %vm690_vm11, %v1180_v7 }
 0x2ca   : > { %1513 = vmatmul.mubr.msk.f32.vlgmr.msra.gmra.mrb[2].mxu1 %vm690_vm11, %v1180_v7 }
 0x39c   : > { %v1290_v51 = vpop.f32.mrb[2].mxu0 }
 0x39d   : > { %v1366_v56 = vmax.f32 %v1290_v51, 0.0  ;;  %v1292_v57 = vpop.f32.mrb[3].mxu0  ;;  %v1361_v58 = vpop.f32.mrb[2].mxu1 }
 0x39e   : > { %v1367_v50 = vmax.f32 %v1292_v57, 0.0  ;;  %v1368_v1 = vmax.f32 %v1361_v58, 0.0  ;;  %v1363_v0 = vpop.f32.mrb[3].mxu1 }
 0x39f   : > { %1370 = vst [vmem:[%s256_s30] sm:$0xff] %v1366_v56  ;;  %v1369_v59 = vmax.f32 %v1363_v0, 0.0 }
 0x3a0   : > { %1371 = vst [vmem:[%s256_s30 + $0x8] sm:$0xff] %v1367_v50  ;;  %1514 = vst [vmem:[%s256_s30 + $0x10] sm:$0xff] %v1368_v1 }
 0x3a1   : > { %1515 = vst [vmem:[%s256_s30 + $0x18] sm:$0xff] %v1369_v59 }
 0x3a2   : > { %1842 = shalt.err (!%p1839_p13)
}
 0x3a3   : > { %s1843_s29 = scalar_lea.hbm %s2572_s7, 512  ;;  %s1847_s13 = scalar_lea.hbm %s2621_s4, 1024 }
 0x3a4   : > { %p1844_p0 = scmp.ne.s32.totalorder %s2572_s7, %s1843_s29  ;;  %p1848_p9 = scmp.lt.u32.totalorder %s2572_s7, %s2621_s4 }
 0x3a5   : > { %p1849_p12 = scmp.lt.u32.totalorder %s1847_s13, %s1843_s29  ;;  %p1851_p1 = scmp.lt.u32.totalorder %s1843_s29, %s2572_s7 }
 0x3a6   : > { %p1845_p5 = pnand %p1844_p0, %p2093_p6 }
 0x3a7   : > { %p1850_p2 = por %p1849_p12, %p1848_p9 }
 0x3a8   : > { %p1846_p11 = pneg %p1845_p5 }
 0x3a9   : > { %p1852_p4 = por %p1851_p1, %p1850_p2 }
 0x3ab   : > { %p1853_p8 = pnand %p1852_p4, %p1846_p11 }
 0x3ad   : > { %1856 = shalt.err (!%p1853_p8)
}
 0x3ae   : > { %s1925_s20 = smov 256  }
 0x3af   : > { %1636 = dma.vmem_to_hbm [thread:$0]  (%p2093_p6), %s2567_s14, 512, %s2572_s7, %s1376_s19, %s1925_s20, %s1925_s20, %s1913_s23  }
 0x3b0 PF: > { %s1405_s26 = sand.u32 1, %s1891_s15   ;;  %p2641_p3 = scmp.ne.s32.totalorder %s2626_s22, 0 }
 0x3b1   : > { %p2642_p7 = scmp.ge.s32.totalorder %s1903_s18, 2  ;;  %s1406_s10 = scalar_lea.sflag [#allocation6], %s1405_s26 }
 0x3b3   : > { %p1653_p10 = pnand %p2642_p7, %p2641_p3 }
 0x3b5   : > { %1886 = dma.done.wait (!%p1653_p10), %s1406_s10, 512  }
 0x3b6   : > { %1888 = vsyncadd (!%p1653_p10), %s1406_s10, 4294966784  ;;  %p19_p13 = scmp.ge.s32.totalorder %s2079_s8, 4   ;;  %s2643_s15 = smov %s1895_s16 }
 0x3b7   : > { %s2644_s16 = smov %s1899_s17  ;;  %s2645_s17 = smov %s2089_s11 }
 0x3b8   : > { %s2646_s18 = smov %s2079_s8  ;;  %21 = sbr.rel (!%p19_p13) target bundleno = 7 (0x7), region = 102 }
 0x3bf   :  { %1411 = vsyncpa [#allocation5], 1 }
 0x3c0   :  { %1413 = vsyncpa [#allocation5 + $0x1], 1 }
 0x3c1   :  { %1414 = vsyncpa [#allocation8], 1 }
 0x3c2   :  { %1415 = vsyncpa [#allocation11], 1 }
 0x3c3   :  { %1416 = vsyncpa [#allocation6], 1 }
 0x3c4   :  { %1418 = vsyncpa [#allocation6 + $0x1], 1 }

</bundles_post_ra>
